<compile_context>
chip_gen: v6e
topology: v6e:2x2x1
jax: 0.10.0
libtpu: 0.0.40
codegen_flags: <defaults>
</compile_context>

<pallas_src>
import functools

import jax
import jax.numpy as jnp
from jax import lax
from jax.experimental import pallas as pl
from jax.experimental.pallas import tpu as pltpu

EPS = 1e-5
VMEM_LIMIT = 48 * 1024 * 1024  # <= v7x physical (64 MiB), plenty on v5e/v6e (128 MiB)


# ----------------------------------------------------------------------------
# host-side weight preparation
# ----------------------------------------------------------------------------

def _banded_weights(w_torch, width):
    """(Cout, Cin, 3, 3) torch conv weight -> (3, W*Cin, W*Cout) bf16 block-banded
    matrices: band[dh, q*Cin+ci, w*Cout+co] = w[co, ci, dh, q-w+1] if |q-w|<=1 else 0.
    Horizontal zero-padding is folded into the band structure."""
    cin = w_torch.shape[1]
    cout = w_torch.shape[0]
    wt = jnp.transpose(w_torch, (2, 3, 1, 0)).astype(jnp.float32)   # (3,3,Cin,Cout) [dh,dw,ci,co]
    q = jnp.arange(width)[None, None, :]                            # input column
    wc = jnp.arange(width)[None, :, None]                           # output column
    dw = jnp.arange(3)[:, None, None]
    sel = (q == wc + dw - 1).astype(jnp.float32)                    # (3, W, W) [dw, w, q]
    band = jnp.einsum('dwq,hdio->hqiwo', sel, wt)                   # (3, W, Cin, W, Cout)
    return band.reshape(3, width * cin, width * cout).astype(jnp.bfloat16)


def _pool_select_matrices(width, c):
    """0/1 selection matrices for horizontal 2:1 pooling in merged (W*C) lane layout."""
    wq = width // 2
    li = jnp.arange(width * c)
    lo = jnp.arange(wq * c)
    wi, ci = li // c, li % c
    wo, co = lo // c, lo % c
    same_c = ci[:, None] == co[None, :]
    s0 = (wi[:, None] == 2 * wo[None, :]) & same_c
    s1 = (wi[:, None] == 2 * wo[None, :] + 1) & same_c
    return jnp.stack([s0, s1]).astype(jnp.bfloat16)                 # (2, W*C, Wq*C)


# ----------------------------------------------------------------------------
# conv pass: [fused previous-layer affine(+ReLU)] -> 3x3 conv as 3 banded matmuls
#            -> lane-dense pre-BN output + per-image BN partial sums
# ----------------------------------------------------------------------------

def _conv3x3_kernel(x_ref, sc_ref, sh_ref, wb_ref, z_ref, ss_ref, xpad_ref,
                    *, h, wcin, wcout, relu):
    # fused per-channel affine (folded BN of the previous layer) + optional ReLU
    a = x_ref[0].astype(jnp.float32) * sc_ref[...] + sh_ref[...]     # (H, W*Cin)
    if relu:
        a = jnp.maximum(a, 0.0)

    # vertical zero padding via a small VMEM scratch (no reshapes / lane concat)
    zrow = jnp.zeros((1, wcin), jnp.bfloat16)
    xpad_ref[0:1, :] = zrow
    xpad_ref[h + 1:h + 2, :] = zrow
    xpad_ref[1:h + 1, :] = a.astype(jnp.bfloat16)

    # three banded matmuls (one per kernel row), register-accumulated in f32
    acc = jnp.dot(xpad_ref[0:h, :], wb_ref[0], preferred_element_type=jnp.float32)
    acc = acc + jnp.dot(xpad_ref[1:h + 1, :], wb_ref[1], preferred_element_type=jnp.float32)
    acc = acc + jnp.dot(xpad_ref[2:h + 2, :], wb_ref[2], preferred_element_type=jnp.float32)

    zb = acc.astype(jnp.bfloat16)                                    # (H, W*Cout) lane-dense
    z_ref[0] = zb

    # BN partials from the values that will actually be normalized (consistent stats)
    zf = zb.astype(jnp.float32)
    ss_ref[0, 0:1, :] = jnp.sum(zf, axis=0, keepdims=True)
    ss_ref[0, 1:2, :] = jnp.sum(zf * zf, axis=0, keepdims=True)


def _conv3x3_pass(xm, w_torch, sc, sh, *, relu, width, cin, cout):
    """xm: (N, H, W*Cin) bf16 merged layout. Returns pre-BN z (N,H,W*Cout) bf16 and
    per-image BN partial sums (N, 2, W*Cout) f32."""
    n, h, wcin = xm.shape
    assert wcin == width * cin
    wcout = width * cout
    wband = _banded_weights(w_torch, width)                          # (3, W*Cin, W*Cout)
    if sc is None:
        sc = jnp.ones((1, wcin), jnp.float32)
        sh = jnp.zeros((1, wcin), jnp.float32)

    kernel = functools.partial(_conv3x3_kernel, h=h, wcin=wcin, wcout=wcout, relu=relu)
    flops = 2 * n * h * 3 * wcin * wcout
    bytes_accessed = (n * h * wcin * 2 + 2 * wcin * 4 + 3 * wcin * wcout * 2
                      + n * h * wcout * 2 + n * 2 * wcout * 4)

    z, ss = pl.pallas_call(
        kernel,
        grid=(n,),
        in_specs=[
            pl.BlockSpec((1, h, wcin), lambda i: (i, 0, 0)),          # activation (merged)
            pl.BlockSpec((1, wcin), lambda i: (0, 0)),                # folded BN scale
            pl.BlockSpec((1, wcin), lambda i: (0, 0)),                # folded BN shift
            pl.BlockSpec((3, wcin, wcout), lambda i: (0, 0, 0)),      # banded weights
        ],
        out_specs=[
            pl.BlockSpec((1, h, wcout), lambda i: (i, 0, 0)),         # pre-BN conv out
            pl.BlockSpec((1, 2, wcout), lambda i: (i, 0, 0)),         # BN partial sums
        ],
        out_shape=[
            jax.ShapeDtypeStruct((n, h, wcout), jnp.bfloat16),
            jax.ShapeDtypeStruct((n, 2, wcout), jnp.float32),
        ],
        scratch_shapes=[pltpu.VMEM((h + 2, wcin), jnp.bfloat16)],     # vertical halo pad
        compiler_params=pltpu.CompilerParams(
            dimension_semantics=("parallel",), vmem_limit_bytes=VMEM_LIMIT),
        cost_estimate=pl.CostEstimate(flops=flops, transcendentals=0,
                                      bytes_accessed=bytes_accessed),
    )(xm, sc, sh, wband)
    return z, ss


def _bn_fold(ss, gamma, beta, count, width, c):
    """Reduce lane-wide per-image partials to exact global BN stats and fold with
    gamma/beta into per-channel scale/shift, tiled to the merged (1, W*C) layout."""
    s = jnp.sum(ss.reshape(ss.shape[0], 2, width, c), axis=(0, 2))    # (2, C)
    m = jnp.float32(count)
    mean = s[0] / m
    var = jnp.maximum(s[1] / m - mean * mean, 0.0)                    # biased variance
    scale = gamma.astype(jnp.float32) * lax.rsqrt(var + EPS)
    shift = beta.astype(jnp.float32) - mean * scale
    return (jnp.tile(scale, width).reshape(1, width * c),
            jnp.tile(shift, width).reshape(1, width * c))


# ----------------------------------------------------------------------------
# standalone BN-apply + ReLU (final layer only), whole-image lane-dense blocks
# ----------------------------------------------------------------------------

def _bn_relu_kernel(z_ref, sc_ref, sh_ref, o_ref):
    y = z_ref[0].astype(jnp.float32) * sc_ref[...] + sh_ref[...]
    o_ref[0] = jnp.maximum(y, 0.0).astype(o_ref.dtype)


def _bn_relu(z, sc, sh):
    n, h, wc = z.shape
    return pl.pallas_call(
        _bn_relu_kernel,
        grid=(n,),
        in_specs=[pl.BlockSpec((1, h, wc), lambda i: (i, 0, 0)),
                  pl.BlockSpec((1, wc), lambda i: (0, 0)),
                  pl.BlockSpec((1, wc), lambda i: (0, 0))],
        out_specs=pl.BlockSpec((1, h, wc), lambda i: (i, 0, 0)),
        out_shape=jax.ShapeDtypeStruct((n, h, wc), jnp.bfloat16),
        compiler_params=pltpu.CompilerParams(
            dimension_semantics=("parallel",), vmem_limit_bytes=VMEM_LIMIT),
    )(z, sc, sh)


# ----------------------------------------------------------------------------
# MaxPool2d(2,2): lane-dense in / lane-dense out, single kernel per image
# ----------------------------------------------------------------------------

def _maxpool_kernel(x_ref, s_ref, o_ref, *, wc):
    row = x_ref[0]                                           # (Hq, 2*W*C)
    v = jnp.maximum(row[:, :wc], row[:, wc:])                # vertical pair max (Hq, W*C)
    p0 = jnp.dot(v, s_ref[0], preferred_element_type=jnp.float32)   # exact even-col pick
    p1 = jnp.dot(v, s_ref[1], preferred_element_type=jnp.float32)   # exact odd-col pick
    o_ref[0] = jnp.maximum(p0, p1).astype(o_ref.dtype)


def maxpool2x2(x_nhwc):
    n, h, w, c = x_nhwc.shape
    hq, wq = h // 2, w // 2
    wc = w * c
    xv = x_nhwc.reshape(n, hq, 2 * wc)                        # free metadata reshape
    sel = _pool_select_matrices(w, c)                         # (2, W*C, Wq*C)
    return pl.pallas_call(
        functools.partial(_maxpool_kernel, wc=wc),
        grid=(n,),
        in_specs=[pl.BlockSpec((1, hq, 2 * wc), lambda i: (i, 0, 0)),
                  pl.BlockSpec((2, wc, wq * c), lambda i: (0, 0, 0))],
        out_specs=pl.BlockSpec((1, hq, wq * c), lambda i: (i, 0, 0)),
        out_shape=jax.ShapeDtypeStruct((n, hq, wq * c), jnp.bfloat16),
        compiler_params=pltpu.CompilerParams(
            dimension_semantics=("parallel",), vmem_limit_bytes=VMEM_LIMIT),
    )(xv, sel)


# ----------------------------------------------------------------------------
# module forward
# ----------------------------------------------------------------------------

def down_block_forward(params, x_nchw, down_size):
    """UNet_down_block.forward: NCHW f32 in -> NCHW f32 out."""
    n, cin, h, w = x_nchw.shape
    cout = params['w1'].shape[0]
    x = jnp.transpose(x_nchw, (0, 2, 3, 1)).astype(jnp.bfloat16)      # NHWC bf16
    if down_size:
        xm = maxpool2x2(x)                                            # (N, H/2, (W/2)*Cin)
        h, w = h // 2, w // 2
    else:
        xm = x.reshape(n, h, w * cin)                                 # merged layout

    # conv1 (no fused input affine / ReLU). Bias omitted: cancels under training-mode BN.
    z1, ss1 = _conv3x3_pass(xm, params['w1'], None, None,
                            relu=False, width=w, cin=cin, cout=cout)
    sc1, sh1 = _bn_fold(ss1, params['g1'], params['be1'], n * h * w, w, cout)

    # conv2 with bn1-apply + ReLU fused into its input path
    z2, ss2 = _conv3x3_pass(z1, params['w2'], sc1, sh1,
                            relu=True, width=w, cin=cout, cout=cout)
    sc2, sh2 = _bn_fold(ss2, params['g2'], params['be2'], n * h * w, w, cout)

    y = _bn_relu(z2, sc2, sh2)                                        # (N, H, W*Cout) bf16
    y = y.reshape(n, h, w, cout)
    return jnp.transpose(y, (0, 3, 1, 2)).astype(jnp.float32)         # NHWC -> NCHW f32


# ----------------------------------------------------------------------------
# parameters (PyTorch-default init) + pure-JAX f32 reference
# ----------------------------------------------------------------------------

def _init_conv(key, cout, cin, k):
    kw, kb = jax.random.split(key)
    bound = float((cin * k * k) ** -0.5)
    w = jax.random.uniform(kw, (cout, cin, k, k), jnp.float32, -bound, bound)
    b = jax.random.uniform(kb, (cout,), jnp.float32, -bound, bound)
    return w, b


def init_down_block(key, cin, cout):
    k1, k2 = jax.random.split(key)
    w1, b1 = _init_conv(k1, cout, cin, 3)
    w2, b2 = _init_conv(k2, cout, cout, 3)
    # conv3 / bn3 are defined in the PyTorch module but unused in forward(): omitted.
    return {'w1': w1, 'b1': b1, 'g1': jnp.ones((cout,), jnp.float32),
            'be1': jnp.zeros((cout,), jnp.float32),
            'w2': w2, 'b2': b2, 'g2': jnp.ones((cout,), jnp.float32),
            'be2': jnp.zeros((cout,), jnp.float32)}


def _ref_forward(params, x, down_size):
    """f32 reference matching the PyTorch module (includes the conv bias,
    which cancels under training-mode BN)."""
    if down_size:
        n, c, h, w = x.shape
        x = x.reshape(n, c, h // 2, 2, w // 2, 2).max(axis=(3, 5))

    def cbr(x, w, b, g, be):
        y = lax.conv_general_dilated(x, w, (1, 1), ((1, 1), (1, 1)),
                                     dimension_numbers=('NCHW', 'OIHW', 'NCHW'))
        y = y + b[None, :, None, None]
        mean = y.mean(axis=(0, 2, 3))
        var = ((y - mean[None, :, None, None]) ** 2).mean(axis=(0, 2, 3))
        yn = (y - mean[None, :, None, None]) * lax.rsqrt(var[None, :, None, None] + EPS)
        return jnp.maximum(yn * g[None, :, None, None] + be[None, :, None, None], 0.0)

    x = cbr(x, params['w1'], params['b1'], params['g1'], params['be1'])
    x = cbr(x, params['w2'], params['b2'], params['g2'], params['be2'])
    return x


# ----------------------------------------------------------------------------

if __name__ == "__main__":
    key = jax.random.PRNGKey(0)
    kp1, kp2, kx = jax.random.split(key, 3)

    # Two chained instances, as inside the UNet:
    #   block_a = UNet_down_block(4, 16, down_size=False)
    #   block_b = UNet_down_block(16, 32, down_size=True)
    p_a = init_down_block(kp1, 4, 16)
    p_b = init_down_block(kp2, 16, 32)
    x = jax.random.normal(kx, (2, 4, 16, 16), dtype=jnp.float32)

    fwd_a = jax.jit(functools.partial(down_block_forward, down_size=False))
    fwd_b = jax.jit(functools.partial(down_block_forward, down_size=True))

    y_a = fwd_a(p_a, x)
    y_b = fwd_b(p_b, y_a)
    y_a, y_b = jax.block_until_ready((y_a, y_b))

    assert y_a.shape == (2, 16, 16, 16), y_a.shape
    assert y_b.shape == (2, 32, 8, 8), y_b.shape
    assert bool(jnp.all(jnp.isfinite(y_a))) and bool(jnp.all(jnp.isfinite(y_b)))
    assert bool(jnp.all(y_a >= 0.0)) and bool(jnp.all(y_b >= 0.0))      # ReLU range

    # correctness vs f32 reference (loose tolerance: bf16 activation/weight pipeline)
    r_a = _ref_forward(p_a, x, False)
    r_b = _ref_forward(p_b, y_a, True)
    d_a = jnp.abs(y_a - r_a)
    d_b = jnp.abs(y_b - r_b)
    assert float(jnp.max(d_a)) < 0.35 and float(jnp.mean(d_a)) < 0.06, \
        (float(jnp.max(d_a)), float(jnp.mean(d_a)))
    assert float(jnp.max(d_b)) < 0.35 and float(jnp.mean(d_b)) < 0.06, \
        (float(jnp.max(d_b)), float(jnp.mean(d_b)))

    print("KERNEL_OK")
</pallas_src>

<mosaic_0001>
module attributes {stable_mosaic.version = 11 : i64} {
  func.func @_conv3x3_kernel(%arg0: i32, %arg1: memref<1x16x64xbf16, #tpu.memory_space<vmem>>, %arg2: memref<1x64xf32, #tpu.memory_space<vmem>>, %arg3: memref<1x64xf32, #tpu.memory_space<vmem>>, %arg4: memref<3x64x256xbf16, #tpu.memory_space<vmem>>, %arg5: memref<1x16x256xbf16, #tpu.memory_space<vmem>>, %arg6: memref<1x2x256xf32, #tpu.memory_space<vmem>>, %arg7: memref<18x64xbf16, #tpu.memory_space<vmem>>) attributes {dimension_semantics = [#tpu.dimension_semantics<parallel>], iteration_bounds = array<i64: 2>, scalar_prefetch = 0 : i64, scratch_operands = 1 : i64, tpu.core_type = #tpu.core_type<tc>, window_params = [{transform_indices = @transform_0, window_bounds = array<i64: 1, 16, 64>}, {pipeline_mode = #tpu.pipeline_mode<synchronous>, transform_indices = @transform_1, window_bounds = array<i64: 1, 64>}, {pipeline_mode = #tpu.pipeline_mode<synchronous>, transform_indices = @transform_2, window_bounds = array<i64: 1, 64>}, {pipeline_mode = #tpu.pipeline_mode<synchronous>, transform_indices = @transform_3, window_bounds = array<i64: 3, 64, 256>}, {transform_indices = @transform_4, window_bounds = array<i64: 1, 16, 256>}, {transform_indices = @transform_5, window_bounds = array<i64: 1, 2, 256>}]} {
    %c0 = arith.constant 0 : index
    %c0_0 = arith.constant 0 : index
    %c0_1 = arith.constant 0 : index
    %0 = vector.load %arg1[%c0, %c0_0, %c0_1] : memref<1x16x64xbf16, #tpu.memory_space<vmem>>, vector<1x16x64xbf16>
    %1 = vector.shape_cast %0 : vector<1x16x64xbf16> to vector<16x64xbf16>
    %2 = arith.extf %1 : vector<16x64xbf16> to vector<16x64xf32>
    %c0_2 = arith.constant 0 : index
    %c0_3 = arith.constant 0 : index
    %3 = vector.load %arg2[%c0_2, %c0_3] : memref<1x64xf32, #tpu.memory_space<vmem>>, vector<1x64xf32>
    %4 = vector.broadcast %3 : vector<1x64xf32> to vector<16x64xf32>
    %5 = arith.mulf %2, %4 : vector<16x64xf32>
    %c0_4 = arith.constant 0 : index
    %c0_5 = arith.constant 0 : index
    %6 = vector.load %arg3[%c0_4, %c0_5] : memref<1x64xf32, #tpu.memory_space<vmem>>, vector<1x64xf32>
    %7 = vector.broadcast %6 : vector<1x64xf32> to vector<16x64xf32>
    %8 = arith.addf %5, %7 : vector<16x64xf32>
    %cst = arith.constant 0.000000e+00 : bf16
    %9 = vector.broadcast %cst : bf16 to vector<1x64xbf16>
    %c0_6 = arith.constant 0 : index
    %c0_7 = arith.constant 0 : index
    %10 = vector.load %arg7[%c0_6, %c0_7] : memref<18x64xbf16, #tpu.memory_space<vmem>>, vector<1x64xbf16>
    tpu.vector_store %arg7[%c0_6, %c0_7], %9 {strides = array<i32>} : memref<18x64xbf16, #tpu.memory_space<vmem>>, vector<1x64xbf16>,
    %c17 = arith.constant 17 : index
    %c0_8 = arith.constant 0 : index
    %11 = vector.load %arg7[%c17, %c0_8] : memref<18x64xbf16, #tpu.memory_space<vmem>>, vector<1x64xbf16>
    tpu.vector_store %arg7[%c17, %c0_8], %9 {strides = array<i32>} : memref<18x64xbf16, #tpu.memory_space<vmem>>, vector<1x64xbf16>,
    %12 = arith.truncf %8 : vector<16x64xf32> to vector<16x64xbf16>
    %c1 = arith.constant 1 : index
    %c0_9 = arith.constant 0 : index
    %13 = vector.load %arg7[%c1, %c0_9] : memref<18x64xbf16, #tpu.memory_space<vmem>>, vector<16x64xbf16>
    tpu.vector_store %arg7[%c1, %c0_9], %12 {strides = array<i32>} : memref<18x64xbf16, #tpu.memory_space<vmem>>, vector<16x64xbf16>,
    %c0_10 = arith.constant 0 : index
    %c0_11 = arith.constant 0 : index
    %14 = vector.load %arg7[%c0_10, %c0_11] : memref<18x64xbf16, #tpu.memory_space<vmem>>, vector<16x64xbf16>
    %c0_12 = arith.constant 0 : index
    %c0_13 = arith.constant 0 : index
    %c0_14 = arith.constant 0 : index
    %15 = vector.load %arg4[%c0_12, %c0_13, %c0_14] : memref<3x64x256xbf16, #tpu.memory_space<vmem>>, vector<1x64x256xbf16>
    %16 = vector.shape_cast %15 : vector<1x64x256xbf16> to vector<64x256xbf16>
    %cst_15 = arith.constant dense<0.000000e+00> : vector<16x256xf32>
    %17 = tpu.matmul %14, %16, %cst_15 {dimension_numbers = #tpu.dot_dimension_numbers<[1], [0], [0], [1], [0, 0, 1, 1], [], []>} : vector<16x64xbf16>, vector<64x256xbf16>, vector<16x256xf32> -> vector<16x256xf32>
    %c1_16 = arith.constant 1 : index
    %c0_17 = arith.constant 0 : index
    %18 = vector.load %arg7[%c1_16, %c0_17] : memref<18x64xbf16, #tpu.memory_space<vmem>>, vector<16x64xbf16>
    %c1_18 = arith.constant 1 : index
    %c0_19 = arith.constant 0 : index
    %c0_20 = arith.constant 0 : index
    %19 = vector.load %arg4[%c1_18, %c0_19, %c0_20] : memref<3x64x256xbf16, #tpu.memory_space<vmem>>, vector<1x64x256xbf16>
    %20 = vector.shape_cast %19 : vector<1x64x256xbf16> to vector<64x256xbf16>
    %cst_21 = arith.constant dense<0.000000e+00> : vector<16x256xf32>
    %21 = tpu.matmul %18, %20, %cst_21 {dimension_numbers = #tpu.dot_dimension_numbers<[1], [0], [0], [1], [0, 0, 1, 1], [], []>} : vector<16x64xbf16>, vector<64x256xbf16>, vector<16x256xf32> -> vector<16x256xf32>
    %22 = arith.addf %17, %21 : vector<16x256xf32>
    %c2 = arith.constant 2 : index
    %c0_22 = arith.constant 0 : index
    %23 = vector.load %arg7[%c2, %c0_22] : memref<18x64xbf16, #tpu.memory_space<vmem>>, vector<16x64xbf16>
    %c2_23 = arith.constant 2 : index
    %c0_24 = arith.constant 0 : index
    %c0_25 = arith.constant 0 : index
    %24 = vector.load %arg4[%c2_23, %c0_24, %c0_25] : memref<3x64x256xbf16, #tpu.memory_space<vmem>>, vector<1x64x256xbf16>
    %25 = vector.shape_cast %24 : vector<1x64x256xbf16> to vector<64x256xbf16>
    %cst_26 = arith.constant dense<0.000000e+00> : vector<16x256xf32>
    %26 = tpu.matmul %23, %25, %cst_26 {dimension_numbers = #tpu.dot_dimension_numbers<[1], [0], [0], [1], [0, 0, 1, 1], [], []>} : vector<16x64xbf16>, vector<64x256xbf16>, vector<16x256xf32> -> vector<16x256xf32>
    %27 = arith.addf %22, %26 : vector<16x256xf32>
    %28 = arith.truncf %27 : vector<16x256xf32> to vector<16x256xbf16>
    %c0_27 = arith.constant 0 : index
    %c0_28 = arith.constant 0 : index
    %c0_29 = arith.constant 0 : index
    %29 = vector.load %arg5[%c0_27, %c0_28, %c0_29] : memref<1x16x256xbf16, #tpu.memory_space<vmem>>, vector<1x16x256xbf16>
    %30 = vector.shape_cast %29 : vector<1x16x256xbf16> to vector<16x256xbf16>
    %31 = vector.shape_cast %28 : vector<16x256xbf16> to vector<1x16x256xbf16>
    tpu.vector_store %arg5[%c0_27, %c0_28, %c0_29], %31 {strides = array<i32>} : memref<1x16x256xbf16, #tpu.memory_space<vmem>>, vector<1x16x256xbf16>,
    %32 = arith.extf %28 : vector<16x256xbf16> to vector<16x256xf32>
    %cst_30 = arith.constant dense<0.000000e+00> : vector<256xf32>
    %33 = vector.multi_reduction <add>, %32, %cst_30 [0] : vector<16x256xf32> to vector<256xf32>
    %34 = vector.shape_cast %33 : vector<256xf32> to vector<1x256xf32>
    %c0_31 = arith.constant 0 : index
    %c0_32 = arith.constant 0 : index
    %c0_33 = arith.constant 0 : index
    %35 = vector.load %arg6[%c0_31, %c0_32, %c0_33] : memref<1x2x256xf32, #tpu.memory_space<vmem>>, vector<1x1x256xf32>
    %36 = vector.shape_cast %35 : vector<1x1x256xf32> to vector<1x256xf32>
    %37 = vector.shape_cast %34 : vector<1x256xf32> to vector<1x1x256xf32>
    tpu.vector_store %arg6[%c0_31, %c0_32, %c0_33], %37 {strides = array<i32>} : memref<1x2x256xf32, #tpu.memory_space<vmem>>, vector<1x1x256xf32>,
    %38 = arith.mulf %32, %32 : vector<16x256xf32>
    %cst_34 = arith.constant dense<0.000000e+00> : vector<256xf32>
    %39 = vector.multi_reduction <add>, %38, %cst_34 [0] : vector<16x256xf32> to vector<256xf32>
    %40 = vector.shape_cast %39 : vector<256xf32> to vector<1x256xf32>
    %c0_35 = arith.constant 0 : index
    %c1_36 = arith.constant 1 : index
    %c0_37 = arith.constant 0 : index
    %41 = vector.load %arg6[%c0_35, %c1_36, %c0_37] : memref<1x2x256xf32, #tpu.memory_space<vmem>>, vector<1x1x256xf32>
    %42 = vector.shape_cast %41 : vector<1x1x256xf32> to vector<1x256xf32>
    %43 = vector.shape_cast %40 : vector<1x256xf32> to vector<1x1x256xf32>
    tpu.vector_store %arg6[%c0_35, %c1_36, %c0_37], %43 {strides = array<i32>} : memref<1x2x256xf32, #tpu.memory_space<vmem>>, vector<1x1x256xf32>,
    return
  }
  func.func @transform_0(%arg0: i32) -> (i32, i32, i32) {
    %c0_i32 = arith.constant 0 : i32
    %c0_i32_0 = arith.constant 0 : i32
    %c0_i32_1 = arith.constant 0 : i32
    return %arg0, %c0_i32, %c0_i32_0 : i32, i32, i32
  }
  func.func @transform_1(%arg0: i32) -> (i32, i32) {
    %c0_i32 = arith.constant 0 : i32
    %c0_i32_0 = arith.constant 0 : i32
    %c0_i32_1 = arith.constant 0 : i32
    return %c0_i32, %c0_i32_0 : i32, i32
  }
  func.func @transform_2(%arg0: i32) -> (i32, i32) {
    %c0_i32 = arith.constant 0 : i32
    %c0_i32_0 = arith.constant 0 : i32
    %c0_i32_1 = arith.constant 0 : i32
    return %c0_i32, %c0_i32_0 : i32, i32
  }
  func.func @transform_3(%arg0: i32) -> (i32, i32, i32) {
    %c0_i32 = arith.constant 0 : i32
    %c0_i32_0 = arith.constant 0 : i32
    %c0_i32_1 = arith.constant 0 : i32
    %c0_i32_2 = arith.constant 0 : i32
    return %c0_i32, %c0_i32_0, %c0_i32_1 : i32, i32, i32
  }
  func.func @transform_4(%arg0: i32) -> (i32, i32, i32) {
    %c0_i32 = arith.constant 0 : i32
    %c0_i32_0 = arith.constant 0 : i32
    %c0_i32_1 = arith.constant 0 : i32
    return %arg0, %c0_i32, %c0_i32_0 : i32, i32, i32
  }
  func.func @transform_5(%arg0: i32) -> (i32, i32, i32) {
    %c0_i32 = arith.constant 0 : i32
    %c0_i32_0 = arith.constant 0 : i32
    %c0_i32_1 = arith.constant 0 : i32
    return %arg0, %c0_i32, %c0_i32_0 : i32, i32, i32
  }
}

module attributes {stable_mosaic.version = 11 : i64} {
  func.func @_conv3x3_kernel(%arg0: i32, %arg1: memref<1x16x256xbf16, #tpu.memory_space<vmem>>, %arg2: memref<1x256xf32, #tpu.memory_space<vmem>>, %arg3: memref<1x256xf32, #tpu.memory_space<vmem>>, %arg4: memref<3x256x256xbf16, #tpu.memory_space<vmem>>, %arg5: memref<1x16x256xbf16, #tpu.memory_space<vmem>>, %arg6: memref<1x2x256xf32, #tpu.memory_space<vmem>>, %arg7: memref<18x256xbf16, #tpu.memory_space<vmem>>) attributes {dimension_semantics = [#tpu.dimension_semantics<parallel>], iteration_bounds = array<i64: 2>, scalar_prefetch = 0 : i64, scratch_operands = 1 : i64, tpu.core_type = #tpu.core_type<tc>, window_params = [{transform_indices = @transform_0, window_bounds = array<i64: 1, 16, 256>}, {pipeline_mode = #tpu.pipeline_mode<synchronous>, transform_indices = @transform_1, window_bounds = array<i64: 1, 256>}, {pipeline_mode = #tpu.pipeline_mode<synchronous>, transform_indices = @transform_2, window_bounds = array<i64: 1, 256>}, {pipeline_mode = #tpu.pipeline_mode<synchronous>, transform_indices = @transform_3, window_bounds = array<i64: 3, 256, 256>}, {transform_indices = @transform_4, window_bounds = array<i64: 1, 16, 256>}, {transform_indices = @transform_5, window_bounds = array<i64: 1, 2, 256>}]} {
    %c0 = arith.constant 0 : index
    %c0_0 = arith.constant 0 : index
    %c0_1 = arith.constant 0 : index
    %0 = vector.load %arg1[%c0, %c0_0, %c0_1] : memref<1x16x256xbf16, #tpu.memory_space<vmem>>, vector<1x16x256xbf16>
    %1 = vector.shape_cast %0 : vector<1x16x256xbf16> to vector<16x256xbf16>
    %2 = arith.extf %1 : vector<16x256xbf16> to vector<16x256xf32>
    %c0_2 = arith.constant 0 : index
    %c0_3 = arith.constant 0 : index
    %3 = vector.load %arg2[%c0_2, %c0_3] : memref<1x256xf32, #tpu.memory_space<vmem>>, vector<1x256xf32>
    %4 = vector.broadcast %3 : vector<1x256xf32> to vector<16x256xf32>
    %5 = arith.mulf %2, %4 : vector<16x256xf32>
    %c0_4 = arith.constant 0 : index
    %c0_5 = arith.constant 0 : index
    %6 = vector.load %arg3[%c0_4, %c0_5] : memref<1x256xf32, #tpu.memory_space<vmem>>, vector<1x256xf32>
    %7 = vector.broadcast %6 : vector<1x256xf32> to vector<16x256xf32>
    %8 = arith.addf %5, %7 : vector<16x256xf32>
    %cst = arith.constant 0.000000e+00 : f32
    %9 = vector.broadcast %cst : f32 to vector<16x256xf32>
    %10 = arith.maximumf %8, %9 : vector<16x256xf32>
    %cst_6 = arith.constant 0.000000e+00 : bf16
    %11 = vector.broadcast %cst_6 : bf16 to vector<1x256xbf16>
    %c0_7 = arith.constant 0 : index
    %c0_8 = arith.constant 0 : index
    %12 = vector.load %arg7[%c0_7, %c0_8] : memref<18x256xbf16, #tpu.memory_space<vmem>>, vector<1x256xbf16>
    tpu.vector_store %arg7[%c0_7, %c0_8], %11 {strides = array<i32>} : memref<18x256xbf16, #tpu.memory_space<vmem>>, vector<1x256xbf16>,
    %c17 = arith.constant 17 : index
    %c0_9 = arith.constant 0 : index
    %13 = vector.load %arg7[%c17, %c0_9] : memref<18x256xbf16, #tpu.memory_space<vmem>>, vector<1x256xbf16>
    tpu.vector_store %arg7[%c17, %c0_9], %11 {strides = array<i32>} : memref<18x256xbf16, #tpu.memory_space<vmem>>, vector<1x256xbf16>,
    %14 = arith.truncf %10 : vector<16x256xf32> to vector<16x256xbf16>
    %c1 = arith.constant 1 : index
    %c0_10 = arith.constant 0 : index
    %15 = vector.load %arg7[%c1, %c0_10] : memref<18x256xbf16, #tpu.memory_space<vmem>>, vector<16x256xbf16>
    tpu.vector_store %arg7[%c1, %c0_10], %14 {strides = array<i32>} : memref<18x256xbf16, #tpu.memory_space<vmem>>, vector<16x256xbf16>,
    %c0_11 = arith.constant 0 : index
    %c0_12 = arith.constant 0 : index
    %16 = vector.load %arg7[%c0_11, %c0_12] : memref<18x256xbf16, #tpu.memory_space<vmem>>, vector<16x256xbf16>
    %c0_13 = arith.constant 0 : index
    %c0_14 = arith.constant 0 : index
    %c0_15 = arith.constant 0 : index
    %17 = vector.load %arg4[%c0_13, %c0_14, %c0_15] : memref<3x256x256xbf16, #tpu.memory_space<vmem>>, vector<1x256x256xbf16>
    %18 = vector.shape_cast %17 : vector<1x256x256xbf16> to vector<256x256xbf16>
    %cst_16 = arith.constant dense<0.000000e+00> : vector<16x256xf32>
    %19 = tpu.matmul %16, %18, %cst_16 {dimension_numbers = #tpu.dot_dimension_numbers<[1], [0], [0], [1], [0, 0, 1, 1], [], []>} : vector<16x256xbf16>, vector<256x256xbf16>, vector<16x256xf32> -> vector<16x256xf32>
    %c1_17 = arith.constant 1 : index
    %c0_18 = arith.constant 0 : index
    %20 = vector.load %arg7[%c1_17, %c0_18] : memref<18x256xbf16, #tpu.memory_space<vmem>>, vector<16x256xbf16>
    %c1_19 = arith.constant 1 : index
    %c0_20 = arith.constant 0 : index
    %c0_21 = arith.constant 0 : index
    %21 = vector.load %arg4[%c1_19, %c0_20, %c0_21] : memref<3x256x256xbf16, #tpu.memory_space<vmem>>, vector<1x256x256xbf16>
    %22 = vector.shape_cast %21 : vector<1x256x256xbf16> to vector<256x256xbf16>
    %cst_22 = arith.constant dense<0.000000e+00> : vector<16x256xf32>
    %23 = tpu.matmul %20, %22, %cst_22 {dimension_numbers = #tpu.dot_dimension_numbers<[1], [0], [0], [1], [0, 0, 1, 1], [], []>} : vector<16x256xbf16>, vector<256x256xbf16>, vector<16x256xf32> -> vector<16x256xf32>
    %24 = arith.addf %19, %23 : vector<16x256xf32>
    %c2 = arith.constant 2 : index
    %c0_23 = arith.constant 0 : index
    %25 = vector.load %arg7[%c2, %c0_23] : memref<18x256xbf16, #tpu.memory_space<vmem>>, vector<16x256xbf16>
    %c2_24 = arith.constant 2 : index
    %c0_25 = arith.constant 0 : index
    %c0_26 = arith.constant 0 : index
    %26 = vector.load %arg4[%c2_24, %c0_25, %c0_26] : memref<3x256x256xbf16, #tpu.memory_space<vmem>>, vector<1x256x256xbf16>
    %27 = vector.shape_cast %26 : vector<1x256x256xbf16> to vector<256x256xbf16>
    %cst_27 = arith.constant dense<0.000000e+00> : vector<16x256xf32>
    %28 = tpu.matmul %25, %27, %cst_27 {dimension_numbers = #tpu.dot_dimension_numbers<[1], [0], [0], [1], [0, 0, 1, 1], [], []>} : vector<16x256xbf16>, vector<256x256xbf16>, vector<16x256xf32> -> vector<16x256xf32>
    %29 = arith.addf %24, %28 : vector<16x256xf32>
    %30 = arith.truncf %29 : vector<16x256xf32> to vector<16x256xbf16>
    %c0_28 = arith.constant 0 : index
    %c0_29 = arith.constant 0 : index
    %c0_30 = arith.constant 0 : index
    %31 = vector.load %arg5[%c0_28, %c0_29, %c0_30] : memref<1x16x256xbf16, #tpu.memory_space<vmem>>, vector<1x16x256xbf16>
    %32 = vector.shape_cast %31 : vector<1x16x256xbf16> to vector<16x256xbf16>
    %33 = vector.shape_cast %30 : vector<16x256xbf16> to vector<1x16x256xbf16>
    tpu.vector_store %arg5[%c0_28, %c0_29, %c0_30], %33 {strides = array<i32>} : memref<1x16x256xbf16, #tpu.memory_space<vmem>>, vector<1x16x256xbf16>,
    %34 = arith.extf %30 : vector<16x256xbf16> to vector<16x256xf32>
    %cst_31 = arith.constant dense<0.000000e+00> : vector<256xf32>
    %35 = vector.multi_reduction <add>, %34, %cst_31 [0] : vector<16x256xf32> to vector<256xf32>
    %36 = vector.shape_cast %35 : vector<256xf32> to vector<1x256xf32>
    %c0_32 = arith.constant 0 : index
    %c0_33 = arith.constant 0 : index
    %c0_34 = arith.constant 0 : index
    %37 = vector.load %arg6[%c0_32, %c0_33, %c0_34] : memref<1x2x256xf32, #tpu.memory_space<vmem>>, vector<1x1x256xf32>
    %38 = vector.shape_cast %37 : vector<1x1x256xf32> to vector<1x256xf32>
    %39 = vector.shape_cast %36 : vector<1x256xf32> to vector<1x1x256xf32>
    tpu.vector_store %arg6[%c0_32, %c0_33, %c0_34], %39 {strides = array<i32>} : memref<1x2x256xf32, #tpu.memory_space<vmem>>, vector<1x1x256xf32>,
    %40 = arith.mulf %34, %34 : vector<16x256xf32>
    %cst_35 = arith.constant dense<0.000000e+00> : vector<256xf32>
    %41 = vector.multi_reduction <add>, %40, %cst_35 [0] : vector<16x256xf32> to vector<256xf32>
    %42 = vector.shape_cast %41 : vector<256xf32> to vector<1x256xf32>
    %c0_36 = arith.constant 0 : index
    %c1_37 = arith.constant 1 : index
    %c0_38 = arith.constant 0 : index
    %43 = vector.load %arg6[%c0_36, %c1_37, %c0_38] : memref<1x2x256xf32, #tpu.memory_space<vmem>>, vector<1x1x256xf32>
    %44 = vector.shape_cast %43 : vector<1x1x256xf32> to vector<1x256xf32>
    %45 = vector.shape_cast %42 : vector<1x256xf32> to vector<1x1x256xf32>
    tpu.vector_store %arg6[%c0_36, %c1_37, %c0_38], %45 {strides = array<i32>} : memref<1x2x256xf32, #tpu.memory_space<vmem>>, vector<1x1x256xf32>,
    return
  }
  func.func @transform_0(%arg0: i32) -> (i32, i32, i32) {
    %c0_i32 = arith.constant 0 : i32
    %c0_i32_0 = arith.constant 0 : i32
    %c0_i32_1 = arith.constant 0 : i32
    return %arg0, %c0_i32, %c0_i32_0 : i32, i32, i32
  }
  func.func @transform_1(%arg0: i32) -> (i32, i32) {
    %c0_i32 = arith.constant 0 : i32
    %c0_i32_0 = arith.constant 0 : i32
    %c0_i32_1 = arith.constant 0 : i32
    return %c0_i32, %c0_i32_0 : i32, i32
  }
  func.func @transform_2(%arg0: i32) -> (i32, i32) {
    %c0_i32 = arith.constant 0 : i32
    %c0_i32_0 = arith.constant 0 : i32
    %c0_i32_1 = arith.constant 0 : i32
    return %c0_i32, %c0_i32_0 : i32, i32
  }
  func.func @transform_3(%arg0: i32) -> (i32, i32, i32) {
    %c0_i32 = arith.constant 0 : i32
    %c0_i32_0 = arith.constant 0 : i32
    %c0_i32_1 = arith.constant 0 : i32
    %c0_i32_2 = arith.constant 0 : i32
    return %c0_i32, %c0_i32_0, %c0_i32_1 : i32, i32, i32
  }
  func.func @transform_4(%arg0: i32) -> (i32, i32, i32) {
    %c0_i32 = arith.constant 0 : i32
    %c0_i32_0 = arith.constant 0 : i32
    %c0_i32_1 = arith.constant 0 : i32
    return %arg0, %c0_i32, %c0_i32_0 : i32, i32, i32
  }
  func.func @transform_5(%arg0: i32) -> (i32, i32, i32) {
    %c0_i32 = arith.constant 0 : i32
    %c0_i32_0 = arith.constant 0 : i32
    %c0_i32_1 = arith.constant 0 : i32
    return %arg0, %c0_i32, %c0_i32_0 : i32, i32, i32
  }
}

module attributes {stable_mosaic.version = 11 : i64} {
  func.func @_bn_relu_kernel(%arg0: i32, %arg1: memref<1x16x256xbf16, #tpu.memory_space<vmem>>, %arg2: memref<1x256xf32, #tpu.memory_space<vmem>>, %arg3: memref<1x256xf32, #tpu.memory_space<vmem>>, %arg4: memref<1x16x256xbf16, #tpu.memory_space<vmem>>) attributes {dimension_semantics = [#tpu.dimension_semantics<parallel>], iteration_bounds = array<i64: 2>, scalar_prefetch = 0 : i64, scratch_operands = 0 : i64, tpu.core_type = #tpu.core_type<tc>, window_params = [{transform_indices = @transform_0, window_bounds = array<i64: 1, 16, 256>}, {pipeline_mode = #tpu.pipeline_mode<synchronous>, transform_indices = @transform_1, window_bounds = array<i64: 1, 256>}, {pipeline_mode = #tpu.pipeline_mode<synchronous>, transform_indices = @transform_2, window_bounds = array<i64: 1, 256>}, {transform_indices = @transform_3, window_bounds = array<i64: 1, 16, 256>}]} {
    %c0 = arith.constant 0 : index
    %c0_0 = arith.constant 0 : index
    %c0_1 = arith.constant 0 : index
    %0 = vector.load %arg1[%c0, %c0_0, %c0_1] : memref<1x16x256xbf16, #tpu.memory_space<vmem>>, vector<1x16x256xbf16>
    %1 = vector.shape_cast %0 : vector<1x16x256xbf16> to vector<16x256xbf16>
    %2 = arith.extf %1 : vector<16x256xbf16> to vector<16x256xf32>
    %c0_2 = arith.constant 0 : index
    %c0_3 = arith.constant 0 : index
    %3 = vector.load %arg2[%c0_2, %c0_3] : memref<1x256xf32, #tpu.memory_space<vmem>>, vector<1x256xf32>
    %4 = vector.broadcast %3 : vector<1x256xf32> to vector<16x256xf32>
    %5 = arith.mulf %2, %4 : vector<16x256xf32>
    %c0_4 = arith.constant 0 : index
    %c0_5 = arith.constant 0 : index
    %6 = vector.load %arg3[%c0_4, %c0_5] : memref<1x256xf32, #tpu.memory_space<vmem>>, vector<1x256xf32>
    %7 = vector.broadcast %6 : vector<1x256xf32> to vector<16x256xf32>
    %8 = arith.addf %5, %7 : vector<16x256xf32>
    %cst = arith.constant 0.000000e+00 : f32
    %9 = vector.broadcast %cst : f32 to vector<16x256xf32>
    %10 = arith.maximumf %8, %9 : vector<16x256xf32>
    %11 = arith.truncf %10 : vector<16x256xf32> to vector<16x256xbf16>
    %c0_6 = arith.constant 0 : index
    %c0_7 = arith.constant 0 : index
    %c0_8 = arith.constant 0 : index
    %12 = vector.load %arg4[%c0_6, %c0_7, %c0_8] : memref<1x16x256xbf16, #tpu.memory_space<vmem>>, vector<1x16x256xbf16>
    %13 = vector.shape_cast %12 : vector<1x16x256xbf16> to vector<16x256xbf16>
    %14 = vector.shape_cast %11 : vector<16x256xbf16> to vector<1x16x256xbf16>
    tpu.vector_store %arg4[%c0_6, %c0_7, %c0_8], %14 {strides = array<i32>} : memref<1x16x256xbf16, #tpu.memory_space<vmem>>, vector<1x16x256xbf16>,
    return
  }
  func.func @transform_0(%arg0: i32) -> (i32, i32, i32) {
    %c0_i32 = arith.constant 0 : i32
    %c0_i32_0 = arith.constant 0 : i32
    %c0_i32_1 = arith.constant 0 : i32
    return %arg0, %c0_i32, %c0_i32_0 : i32, i32, i32
  }
  func.func @transform_1(%arg0: i32) -> (i32, i32) {
    %c0_i32 = arith.constant 0 : i32
    %c0_i32_0 = arith.constant 0 : i32
    %c0_i32_1 = arith.constant 0 : i32
    return %c0_i32, %c0_i32_0 : i32, i32
  }
  func.func @transform_2(%arg0: i32) -> (i32, i32) {
    %c0_i32 = arith.constant 0 : i32
    %c0_i32_0 = arith.constant 0 : i32
    %c0_i32_1 = arith.constant 0 : i32
    return %c0_i32, %c0_i32_0 : i32, i32
  }
  func.func @transform_3(%arg0: i32) -> (i32, i32, i32) {
    %c0_i32 = arith.constant 0 : i32
    %c0_i32_0 = arith.constant 0 : i32
    %c0_i32_1 = arith.constant 0 : i32
    return %arg0, %c0_i32, %c0_i32_0 : i32, i32, i32
  }
}

</mosaic_0001>

<bundles_post_ra>
// kernel: down_block_forward.3
= control target key start
LH: loop header
LB: loop body
LE: loop exit
PB: predicated region body
PF: predicated region fallthrough
CT: control target
= control target key end

     0   :  { %s977_s18 = smov 0   ;;  %s1102_s0 = inlined_call_operand.vmem [shape: bf16[2,16,64], index: 0, kind: input, shape index: {}]   ;;  %s1103_s1 = inlined_call_operand.vmem [shape: f32[1,64], index: 1, kind: input, shape index: {}]   ;;  %s1104_s2 = inlined_call_operand.vmem [shape: f32[1,64], index: 2, kind: input, shape index: {}]   ;;  %s1105_s3 = inlined_call_operand.vmem [shape: bf16[3,64,256], index: 3, kind: input, shape index: {}]   ;;  %s1106_s4 = inlined_call_operand.vmem [shape: bf16[2,16,256], index: 4, kind: output, shape index: {0}]   ;;  %s1107_s5 = inlined_call_operand.vmem [shape: f32[2,2,256], index: 5, kind: output, shape index: {1}]  }
   0x1 LB: > { %s811_s19 = sadd.s32 4294967295, %s943_s18   ;;  %p815_p0 = scmp.ge.s32.totalorder %s943_s18, 1  ;;  %s943_s18 = sphi %s977_s18, %s16_s18  }
   0x2   : > { %p190_p1 = scmp.lt.s32.totalorder %s943_s18, 3 }
   0x4   : > { %p191_p2 = pnand %p815_p0, %p190_p1 }
   0x5   : > { %p223_p3 = scmp.lt.s32.totalorder (!%p191_p2), %s811_s19, 1 }
   0x6   : > { %194 = sbr.rel (%p191_p2) target bundleno = 296 (0x128), region = 36 }
   0xb   : > { %v898_v0 = vld [vmem:[%s1105_s3 + $0x74] ss:$8 sps:$4 sm:$0xff]   ;;  %v900_v1 = vld [vmem:[%s1105_s3 + $0x70] ss:$8 sps:$4 sm:$0xff]   ;;  %v945_v2 = vmov 0   ;;  %s1111_s19 = smov (!%p223_p3, %s811_s19), 1 }
   0xc   : > { %427 = vmatprep.mubr.bf16.mxu0 %v945_v2  ;;  %512 = vmatprep.mubr.bf16.mxu1 %v945_v2  ;;  %v901_v3 = vld [vmem:[%s1105_s3 + $0x34] ss:$8 sps:$4 sm:$0xff]   ;;  %v903_v4 = vld [vmem:[%s1105_s3 + $0x30] ss:$8 sps:$4 sm:$0xff]   ;;  %v904_v5 = vld [vmem:[%s1105_s3 + $0x64] ss:$8 sps:$4 sm:$0xff]  }
   0xd   : > { %403 = vmatprep.subr.bf16.mxu0 %v898_v0  ;;  %v906_v6 = vld [vmem:[%s1105_s3 + $0x60] ss:$8 sps:$4 sm:$0xff]   ;;  %488 = vmatprep.subr.bf16.mxu1 %v901_v3  ;;  %v907_v7 = vld [vmem:[%s1105_s3 + $0x24] ss:$8 sps:$4 sm:$0xff]   ;;  %v910_v9 = vld [vmem:[%s1105_s3 + $0x54] ss:$8 sps:$4 sm:$0xff]  }
   0xe   : > { %404 = vmatpush1.bf16.msra.mxu0 %v900_v1  ;;  %489 = vmatpush1.bf16.msra.mxu1 %v903_v4  ;;  %v909_v8 = vld [vmem:[%s1105_s3 + $0x20] ss:$8 sps:$4 sm:$0xff]   ;;  %s877_s13 = sshll.u32 %s1111_s19, 3  ;;  %v912_v10 = vld [vmem:[%s1105_s3 + $0x50] ss:$8 sps:$4 sm:$0xff]   ;;  %vm261_vm2 = vcmask 516096  }
   0xf   : > { %405 = vmatprep.subr.bf16.mxu0 %v904_v5  ;;  %490 = vmatprep.subr.bf16.mxu1 %v907_v7  ;;  %v913_v11 = vld [vmem:[%s1105_s3 + $0x14] ss:$8 sps:$4 sm:$0xff]   ;;  %v916_v12 = vld [vmem:[%s1105_s3 + $0x44] ss:$8 sps:$4 sm:$0xff]   ;;  %vm262_vm0 = vsmask.f32 256  ;;  %s227_s26 = scalar_lea.vmem %s1102_s0, %s877_s13 }
  0x10   : > { %v915_v13 = vld [vmem:[%s1105_s3 + $0x10] ss:$8 sps:$4 sm:$0xff]   ;;  %vm267_vm1 = vsmask.f32 7938  ;;  %v918_v14 = vld [vmem:[%s1105_s3 + $0x40] ss:$8 sps:$4 sm:$0xff]   ;;  %vm1052_vm3 = vmand %vm261_vm2, %vm262_vm0 }
  0x11   : > { %v919_v15 = vld [vmem:[%s1105_s3 + $0x4] ss:$8 sps:$4 sm:$0xff]   ;;  %v921_v16 = vld [vmem:[%s1105_s3] ss:$8 sps:$4 sm:$0xff]   ;;  %v924_v17 = vld [vmem:[%s1105_s3 + $0xb4] ss:$8 sps:$4 sm:$0xff]  }
  0x12   : > { %406 = vmatpush1.bf16.msra.mxu0 %v906_v6  ;;  %491 = vmatpush1.bf16.msra.mxu1 %v909_v8  ;;  %v885_v18 = vld [vmem:[%s227_s26] sm:$0xff]   ;;  %v269_v25 = vld [vmem:[#allocation2 + $0x8] sm:$0x1]  ;;  %vm268_vm4 = vmand %vm261_vm2, %vm267_vm1  ;;  %vm278_vm5 = vsmask.f32 4368  ;;  %vm300_vm6 = vcmask 519168  }
  0x13   : > { %407 = vmatprep.subr.bf16.mxu0 %v910_v9  ;;  %492 = vmatprep.subr.bf16.mxu1 %v913_v11  ;;  %v822_v19 = vld [vmem:[%s1103_s1] ss:$0 sm:$0xff]  ;;  %v886_v21 = vunpack.c.l.bf16 %v885_v18  ;;  %v887_v22 = vunpack.c.h.bf16 %v885_v18  ;;  %v270_v29 = vsel %vm268_vm4, 0, %v269_v25  ;;  %vm279_vm7 = vmor %vm262_vm0, %vm278_vm5  ;;  %vm391_vm9 = vcmask 523264   ;;  %v922_v58 = vld [vmem:[%s1105_s3 + $0xb0] ss:$8 sps:$4 sm:$0xff]  }
  0x14   : > { %v823_v20 = vld [vmem:[%s1104_s2] ss:$0 sm:$0xff]  ;;  %271 = vst [vmem:[#allocation2 + $0x8] sm:$0x1] %v270_v29  ;;  %vm301_vm8 = vmand %vm300_vm6, %vm267_vm1  ;;  %vm338_vm10 = vsmask.f32 7424 }
  0x15   : > { %v264_v24 = vld [vmem:[#allocation2] sm:$0x1]  ;;  %v250_v27 = vmul.f32 %v886_v21, %v822_v19  ;;  %v251_v28 = vmul.f32 %v887_v22, %v822_v19  ;;  %v929_v60 = vld [vmem:[%s1105_s3 + $0xa4] ss:$8 sps:$4 sm:$0xff]   ;;  %v932_v63 = vld [vmem:[%s1105_s3 + $0x94] ss:$8 sps:$4 sm:$0xff]  }
  0x16   : > { %408 = vmatpush1.bf16.msra.mxu0 %v912_v10  ;;  %493 = vmatpush1.bf16.msra.mxu1 %v915_v13  ;;  %v265_v26 = vsel %vm1052_vm3, 0, %v264_v24  ;;  %v927_v62 = vld [vmem:[%s1105_s3 + $0xa0] ss:$8 sps:$4 sm:$0xff]   ;;  %v930_v1 = vld [vmem:[%s1105_s3 + $0x90] ss:$8 sps:$4 sm:$0xff]   ;;  %vm536_vm11 = vcmask 1046528  }
  0x17   : > { %409 = vmatprep.subr.bf16.mxu0 %v916_v12  ;;  %494 = vmatprep.subr.bf16.mxu1 %v919_v15  ;;  %266 = vst [vmem:[#allocation2] sm:$0x1] %v265_v26  ;;  %v259_v30 = vadd.f32 %v823_v20, %v250_v27  ;;  %v260_v31 = vadd.f32 %v823_v20, %v251_v28  ;;  %v935_v4 = vld [vmem:[%s1105_s3 + $0x84] ss:$8 sps:$4 sm:$0xff]   ;;  %s878_s30 = sshll.u32 %s1111_s19, 4  ;;  %s879_s9 = sshll.u32 %s1111_s19, 2 }
  0x18   : > { %s232_s8 = scalar_lea.vmem %s1106_s4, %s878_s30  ;;  %s237_s12 = scalar_lea.vmem %s1107_s5, %s879_s9 }
  0x19   : > { %v880_v32 = vpack.c.bf16 %v259_v30, %v259_v30  ;;  %v881_v33 = vpack.c.bf16 %v260_v31, %v260_v31 }
  0x1a   : > { %410 = vmatpush1.bf16.msra.mxu0 %v918_v14  ;;  %495 = vmatpush1.bf16.msra.mxu1 %v921_v16 }
  0x1b   : > { %591 = vmatprep.subr.bf16.mxu0 %v924_v17  ;;  %v281_v34 = vshrl.u32 %v880_v32, 16  ;;  %v284_v35 = vshll.u32 %v880_v32, 16  ;;  %v289_v36 = vshrl.u32 %v881_v33, 16  ;;  %v292_v37 = vshll.u32 %v881_v33, 16  ;;  %v307_v41 = vld [vmem:[#allocation2 + $0x8] sm:$0x1] }
  0x1d   : > { %v283_v38 = vrot.slane %v281_v34, 7  ;;  %v291_v39 = vrot.slane %v289_v36, 7 }
  0x1e   : > { %v302_v40 = vld [vmem:[#allocation2] sm:$0xf] }
  0x1f   : > { %v286_v42 = vor.u32 %v284_v35, %v283_v38  ;;  %v287_v43 = vrot.slane %v283_v38, 4  ;;  %v294_v44 = vor.u32 %v292_v37, %v291_v39  ;;  %v296_v45 = vrot.slane %v291_v39, 4 }
  0x21   : > { %v295_v46 = vsel %vm279_vm7, %v287_v43, %v294_v44  ;;  %v303_v47 = vsel %vm301_vm8, %v286_v42, %v302_v40  ;;  %v308_v48 = vsel %vm1052_vm3, %v296_v45, %v307_v41 }
  0x22   : > { %304 = vst [vmem:[#allocation2] sm:$0xf] %v303_v47  ;;  %306 = vst.msk [vmem:[#allocation2 + $0x4] sm:$0xf] %vm300_vm6, %v295_v46 }
  0x23   : > { %309 = vst [vmem:[#allocation2 + $0x8] sm:$0x1] %v308_v48 }
  0x29   : > { %v310_v49 = vld [vmem:[#allocation2] sm:$0xf]  ;;  %v311_v50 = vld [vmem:[#allocation2 + $0x4] sm:$0xf] }
  0x2a   : > { %v834_v51 = vcombine.low %v310_v49, %v311_v50  ;;  %v926_v52 = vld [vmem:[#allocation2 + $0x8] ss:$0 sps:$4 sm:$0x11]   ;;  %v523_v0 = vld [vmem:[#allocation2] sm:$0xe] }
  0x2b   : > { %v347_v55 = vshll.u32 %v926_v52, 16  ;;  %v862_v3 = vcombine.low %v523_v0, %v311_v50  ;;  %v538_v6 = vrot.slane %v926_v52, 1  ;;  %v946_v50 = vmov 1966171168  }
  0x2c   : > { %v340_v53 = vshrl.u32 %v834_v51, 16  ;;  %v342_v54 = vshll.u32 %v834_v51, 16  ;;  %853 = vmatmul.mubr.msk.bf16.vlgmr.msra.gmra.mxu1 %vm391_vm9, %v834_v51  ;;  %v666_v51 = vunpack.c.l.s4 %v946_v50 }
  0x2d   : > { %v349_v57 = vrot.slane %v347_v55, 1  ;;  %v537_v5 = vrot.slane %v862_v3, 1 }
  0x2e   : > { %v344_v56 = vrot.slane %v342_v54, 1 }
  0x2f   : > { %v539_v7 = vsel %vm536_vm11, %v537_v5, %v538_v6 }
  0x30   : > { %v345_v59 = vor.u32 %v344_v56, %v340_v53  ;;  %v668_v53 = vlaneseq }
  0x32   : > { %v350_v61 = vsel %vm338_vm10, %v345_v59, %v349_v57  ;;  %vm682_vm12 = vcmp.lt.s32.totalorder %v668_v53, 256 }
  0x33   : > { %844 = vmatmul.mubr.msk.bf16.vlgmr.msra.gmra.mxu0 %vm391_vm9, %v350_v61 }
  0x34   : > { %592 = vmatpush1.bf16.msra.mxu0 %v922_v58  ;;  %615 = vmatprep.mubr.bf16.mxu0 %v945_v2  ;;  %v933_v2 = vld [vmem:[%s1105_s3 + $0x80] ss:$8 sps:$4 sm:$0xff]  }
  0x35   : > { %593 = vmatprep.subr.bf16.mxu0 %v929_v60  ;;  %v667_v60 = vunpack.c.0.s8 %v666_v51 }
  0x38   : > { %594 = vmatpush1.bf16.msra.mxu0 %v927_v62 }
  0x39   : > { %595 = vmatprep.subr.bf16.mxu0 %v932_v63  ;;  %v669_v63 = vshrl.u32 %v668_v53, 7 }
  0x3b   : > { %v670_v6 = vsub.s32 %v667_v60, %v669_v63 }
  0x3c   : > { %596 = vmatpush1.bf16.msra.mxu0 %v930_v1 }
  0x3d   : > { %597 = vmatprep.subr.bf16.mxu0 %v935_v4 }
  0x40   : > { %598 = vmatpush1.bf16.msra.mxu0 %v933_v2 }
  0x43   : > { %871 = vmatmul.mubr.msk.bf16.vlgmr.msra.gmra.mxu0 %vm391_vm9, %v539_v7 }
  0xec   : > { %v514_v9 = vpop.f32.mrf.mxu1 }
  0xee   : > { %v516_v11 = vpop.f32.mrf.mxu1 }
  0xf0   : > { %v518_v13 = vpop.f32.mrf.mxu1 }
  0xf2   : > { %v520_v18 = vpop.f32.mrf.mxu1 }
  0xf3   : > { %v429_v8 = vpop.f32.mrf.mxu0 }
  0xf4   : > { %v515_v16 = vadd.f32 %v514_v9, %v429_v8 }
  0xf5   : > { %v431_v10 = vpop.f32.mrf.mxu0 }
  0xf6   : > { %v517_v17 = vadd.f32 %v516_v11, %v431_v10 }
  0xf7   : > { %v433_v12 = vpop.f32.mrf.mxu0 }
  0xf8   : > { %v519_v20 = vadd.f32 %v518_v13, %v433_v12 }
  0xf9   : > { %v435_v14 = vpop.f32.mrf.mxu0 }
  0xfa   : > { %v521_v24 = vadd.f32 %v520_v18, %v435_v14 }
 0x103   : > { %v617_v15 = vpop.f32.mrf.mxu0 }
 0x104   : > { %v626_v21 = vadd.f32 %v617_v15, %v515_v16 }
 0x105   : > { %v619_v19 = vpop.f32.mrf.mxu0 }
 0x106   : > { %v627_v22 = vadd.f32 %v619_v19, %v517_v17 }
 0x107   : > { %v621_v23 = vpop.f32.mrf.mxu0 }
 0x108   : > { %v882_v25 = vpack.c.bf16 %v627_v22, %v626_v21  ;;  %v628_v26 = vadd.f32 %v621_v23, %v519_v20 }
 0x109   : > { %v623_v27 = vpop.f32.mrf.mxu0 }
 0x10a   : > { %642 = vst [vmem:[%s232_s8] sm:$0xff] %v882_v25  ;;  %v630_v28 = vpack.c.bf16 %v628_v26, %v626_v21  ;;  %v629_v29 = vadd.f32 %v623_v27, %v521_v24 }
 0x10c   : > { %v644_v30 = vunpack.c.l.bf16 %v630_v28  ;;  %v646_v31 = vunpack.c.h.bf16 %v630_v28  ;;  %v631_v32 = vpack.c.bf16 %v629_v29, %v627_v22  ;;  %v883_v33 = vpack.c.bf16 %v629_v29, %v628_v26 }
 0x10e   : > { %v648_v34 = vadd.f32 %v646_v31, %v644_v30  ;;  %v685_v35 = vmul.f32 %v644_v30, %v644_v30  ;;  %v687_v36 = vmul.f32 %v646_v31, %v646_v31  ;;  %643 = vst [vmem:[%s232_s8 + $0x8] sm:$0xff] %v883_v33  ;;  %v645_v37 = vunpack.c.l.bf16 %v631_v32 }
 0x10f   : > { %v647_v38 = vunpack.c.h.bf16 %v631_v32 }
 0x110   : > { %v649_v39 = vrot.slane %v648_v34, 4  ;;  %v689_v40 = vadd.f32 %v687_v36, %v685_v35  ;;  %v686_v41 = vmul.f32 %v645_v37, %v645_v37 }
 0x111   : > { %v655_v42 = vadd.f32 %v647_v38, %v645_v37  ;;  %v688_v43 = vmul.f32 %v647_v38, %v647_v38 }
 0x112   : > { %v650_v44 = vadd.f32 %v649_v39, %v648_v34  ;;  %v690_v45 = vrot.slane %v689_v40, 4 }
 0x113   : > { %v656_v46 = vrot.slane %v655_v42, 4  ;;  %v696_v47 = vadd.f32 %v688_v43, %v686_v41 }
 0x114   : > { %v651_v48 = vrot.slane %v650_v44, 2  ;;  %v691_v49 = vadd.f32 %v690_v45, %v689_v40 }
 0x115   : > { %v657_v52 = vadd.f32 %v656_v46, %v655_v42  ;;  %v697_v54 = vrot.slane %v696_v47, 4 }
 0x116   : > { %v652_v55 = vadd.f32 %v651_v48, %v650_v44  ;;  %v692_v56 = vrot.slane %v691_v49, 2 }
 0x117   : > { %v658_v57 = vrot.slane %v657_v52, 2  ;;  %v698_v58 = vadd.f32 %v697_v54, %v696_v47 }
 0x118   : > { %v693_v59 = vadd.f32 %v692_v56, %v691_v49  ;;  %v653_v61 = vrot.slane %v652_v55, 1 }
 0x119   : > { %v659_v62 = vadd.f32 %v658_v57, %v657_v52  ;;  %v699_v0 = vrot.slane %v698_v58, 2 }
 0x11a   : > { %v694_v1 = vrot.slane %v693_v59, 1  ;;  %v654_v2 = vadd.f32 %v653_v61, %v652_v55 }
 0x11b   : > { %v660_v3 = vrot.slane %v659_v62, 1  ;;  %v700_v4 = vadd.f32 %v699_v0, %v698_v58 }
 0x11c   : > { %v695_v8 = vadd.f32 %v694_v1, %v693_v59 }
 0x11d   : > { %v661_v5 = vadd.f32 %v660_v3, %v659_v62  ;;  %v701_v7 = vrot.slane %v700_v4, 1 }
 0x11f   : > { %v664_v9 = vcombine.low %v654_v2, %v661_v5  ;;  %v702_v10 = vadd.f32 %v701_v7, %v700_v4 }
 0x121   : > { %v671_v11 = vrot.slane %v664_v9, %v670_v6  ;;  %v705_v12 = vcombine.low %v695_v8, %v702_v10 }
 0x123   : > { %v678_v13 = vrot.slane %v671_v11, %v670_v6  ;;  %v712_v14 = vrot.slane %v705_v12, %v670_v6 }
 0x125   : > { %684 = vst.msk [vmem:[%s237_s12] ss:$2 sm:$0x3] %vm682_vm12, %v678_v13  ;;  %v719_v15 = vrot.slane %v712_v14, %v670_v6 }
 0x127   : > { %874 = vst.msk [vmem:[%s237_s12 + $0x1] ss:$2 sm:$0x3] %vm682_vm12, %v719_v15 }
 0x128 PF: > { %s16_s18 = sadd.s32 1, %s943_s18  }
 0x129   : > { %p13_p4 = scmp.ge.s32.totalorder %s16_s18, 4  }
 0x12b   :  { %15 = sbr.rel (!%p13_p4) target bundleno = 1 (0x1), region = 81 }

// kernel: tile.28
= control target key start
LH: loop header
LB: loop body
LE: loop exit
PB: predicated region body
PF: predicated region fallthrough
CT: control target
= control target key end

     0   :  { %s28_s0 = inlined_call_operand.vmem [shape: f32[16], index: 0, kind: input, shape index: {}]   ;;  %s29_s1 = inlined_call_operand.vmem [shape: f32[16,16], index: 1, kind: output, shape index: {}]  }
   0x1   :  { %v4_v0 = vld [vmem:[%s28_s0] ss:$0 sm:$0xff] }
   0x2   :  { %5 = vst [vmem:[%s29_s1] sm:$0xff] %v4_v0  ;;  %8 = vst [vmem:[%s29_s1 + $0x8] sm:$0xff] %v4_v0 }

// kernel: tile.29
= control target key start
LH: loop header
LB: loop body
LE: loop exit
PB: predicated region body
PF: predicated region fallthrough
CT: control target
= control target key end

     0   :  { %s7_s6 = smov 3  ;;  %s21_s9 = smov 3  ;;  %vm4_vm0 = vcmask 130048   ;;  %vm11_vm1 = vcmask 1048448   ;;  %vm18_vm2 = vcmask 917248   ;;  %vm25_vm3 = vcmask 786048   ;;  %s131_s0 = inlined_call_operand.vmem [shape: f32[16,16], index: 0, kind: input, shape index: {}]   ;;  %s132_s1 = inlined_call_operand.vmem [shape: f32[1,256], index: 1, kind: output, shape index: {}]  }
   0x1   :  { %v69_v0 = vld [vmem:[%s131_s0 + $0x7] ss:$8 sm:%s7_s6]   ;;  %s84_s10 = smov 112   ;;  %v71_v1 = vld [vmem:[%s131_s0 + $0x5] ss:$8 sm:%s21_s9]   ;;  %s14_s13 = smov 3 }
   0x2   :  { %9 = vrot.lane.b32.xlu0 %v69_v0, %s84_s10  ;;  %s85_s14 = smov 80   ;;  %v70_v2 = vld [vmem:[%s131_s0 + $0x6] ss:$8 sm:%s14_s13]   ;;  %s28_s17 = smov 3  ;;  %vm32_vm4 = vcmask 654848   ;;  %vm39_vm5 = vcmask 523648  }
   0x3   :  { %23 = vrot.lane.b32.xlu1 %v71_v1, %s85_s14  ;;  %v72_v3 = vld [vmem:[%s131_s0 + $0x4] ss:$8 sm:%s28_s17]   ;;  %s35_s20 = smov 3  ;;  %s42_s21 = smov 3  ;;  %vm46_vm6 = vcmask 392448   ;;  %vm53_vm7 = vcmask 261248  }
   0x4   :  { %s86_s22 = smov 96   ;;  %s87_s23 = smov 64   ;;  %v73_v4 = vld [vmem:[%s131_s0 + $0x3] ss:$8 sm:%s35_s20]   ;;  %v74_v5 = vld [vmem:[%s131_s0 + $0x2] ss:$8 sm:%s42_s21]  }
   0x5   :  { %s2_s26 = smov 3  ;;  %s49_s29 = smov 3 }
   0x6   :  { %16 = vrot.lane.b32.xlu0 %v70_v2, %s86_s22  ;;  %v3_v6 = vld [vmem:[%s131_s0] ss:$8 sm:%s2_s26]   ;;  %s88_s3 = smov 48   ;;  %s89_s4 = smov 32  }
   0x7   :  { %30 = vrot.lane.b32.xlu1 %v72_v3, %s87_s23  ;;  %5 = vst.msk [vmem:[#allocation0] ss:$8 sm:$0x3] %vm4_vm0, %v3_v6   ;;  %v75_v7 = vld [vmem:[%s131_s0 + $0x1] ss:$8 sm:%s49_s29]   ;;  %s90_s0 = smov 16  }
   0xa   :  { %37 = vrot.lane.b32.xlu0 %v73_v4, %s88_s3 }
   0xb   :  { %44 = vrot.lane.b32.xlu1 %v74_v5, %s89_s4 }
   0xe   :  { %51 = vrot.lane.b32.xlu0 %v75_v7, %s90_s0 }
  0x74   :  { %v10_v8 = vpop.permute.xlu0 %9  }
  0x75   :  { %12 = vst.msk [vmem:[#allocation0] ss:$8 sm:$0x3] %vm11_vm1, %v10_v8   ;;  %v24_v9 = vpop.permute.xlu1 %23  }
  0x78   :  { %v17_v10 = vpop.permute.xlu0 %16  }
  0x79   :  { %19 = vst.msk [vmem:[#allocation0] ss:$8 sm:$0x3] %vm18_vm2, %v17_v10   ;;  %v31_v11 = vpop.permute.xlu1 %30  }
  0x7a   :  { %26 = vst.msk [vmem:[#allocation0] ss:$8 sm:$0x3] %vm25_vm3, %v24_v9  }
  0x7b   :  { %33 = vst.msk [vmem:[#allocation0] ss:$8 sm:$0x3] %vm32_vm4, %v31_v11  }
  0x7c   :  { %v38_v12 = vpop.permute.xlu0 %37  }
  0x7d   :  { %40 = vst.msk [vmem:[#allocation0] ss:$8 sm:$0x3] %vm39_vm5, %v38_v12   ;;  %v45_v13 = vpop.permute.xlu1 %44  }
  0x7e   :  { %47 = vst.msk [vmem:[#allocation0] ss:$8 sm:$0x3] %vm46_vm6, %v45_v13  }
  0x80   :  { %v52_v14 = vpop.permute.xlu0 %51  }
  0x81   :  { %54 = vst.msk [vmem:[#allocation0] ss:$8 sm:$0x3] %vm53_vm7, %v52_v14  }
  0x88   :  { %v59_v15 = vld [vmem:[#allocation0] sm:$0x1]  ;;  %v64_v16 = vld [vmem:[#allocation0 + $0x8] sm:$0x1] }
  0x89   :  { %62 = vst [vmem:[%s132_s1] sm:$0x1] %v59_v15  ;;  %76 = vst [vmem:[%s132_s1 + $0x1] sm:$0x1] %v64_v16 }

// kernel: down_block_forward.4
= control target key start
LH: loop header
LB: loop body
LE: loop exit
PB: predicated region body
PF: predicated region fallthrough
CT: control target
= control target key end

     0   :  { %s1680_s18 = smov 0   ;;  %s2072_s0 = inlined_call_operand.vmem [shape: bf16[2,16,256], index: 0, kind: input, shape index: {}]   ;;  %s2073_s1 = inlined_call_operand.vmem [shape: f32[1,256], index: 1, kind: input, shape index: {}]   ;;  %s2074_s2 = inlined_call_operand.vmem [shape: f32[1,256], index: 2, kind: input, shape index: {}]   ;;  %s2075_s3 = inlined_call_operand.vmem [shape: bf16[3,256,256], index: 3, kind: input, shape index: {}]   ;;  %s2076_s4 = inlined_call_operand.vmem [shape: bf16[2,16,256], index: 4, kind: output, shape index: {0}]   ;;  %s2077_s5 = inlined_call_operand.vmem [shape: f32[2,2,256], index: 5, kind: output, shape index: {1}]  }
   0x1 LB: > { %s1295_s19 = sadd.s32 4294967295, %s1647_s18   ;;  %p1299_p0 = scmp.ge.s32.totalorder %s1647_s18, 1  ;;  %s1647_s18 = sphi %s1680_s18, %s16_s18  }
   0x2   : > { %p190_p1 = scmp.lt.s32.totalorder %s1647_s18, 3 }
   0x4   : > { %p191_p2 = pnand %p1299_p0, %p190_p1 }
   0x5   : > { %p223_p3 = scmp.lt.s32.totalorder (!%p191_p2), %s1295_s19, 1 }
   0x6   : > { %194 = sbr.rel (%p191_p2) target bundleno = 370 (0x172), region = 36 }
   0xb   : > { %v1495_v0 = vld [vmem:[%s2075_s3 + $0x174] ss:$8 sps:$4 sm:$0xff]   ;;  %v1499_v2 = vld [vmem:[%s2075_s3 + $0x170] ss:$8 sps:$4 sm:$0xff]   ;;  %v1501_v4 = vld [vmem:[%s2075_s3 + $0x164] ss:$8 sps:$4 sm:$0xff]   ;;  %v247_v36 = vlaneseq }
   0xc   : > { %v1497_v1 = vld [vmem:[%s2075_s3 + $0x74] ss:$8 sps:$4 sm:$0xff]   ;;  %611 = vmatprep.subr.bf16.mxu0 %v1495_v0  ;;  %v1500_v3 = vld [vmem:[%s2075_s3 + $0x70] ss:$8 sps:$4 sm:$0xff]   ;;  %v1503_v5 = vld [vmem:[%s2075_s3 + $0x64] ss:$8 sps:$4 sm:$0xff]  }
   0xd   : > { %816 = vmatprep.subr.bf16.mxu1 %v1497_v1  ;;  %612 = vmatpush1.bf16.msra.mxu0 %v1499_v2  ;;  %v1505_v6 = vld [vmem:[%s2075_s3 + $0x160] ss:$8 sps:$4 sm:$0xff]   ;;  %v1507_v8 = vld [vmem:[%s2075_s3 + $0x154] ss:$8 sps:$4 sm:$0xff]   ;;  %v1511_v10 = vld [vmem:[%s2075_s3 + $0x150] ss:$8 sps:$4 sm:$0xff]  }
   0xe   : > { %817 = vmatpush1.bf16.msra.mxu1 %v1500_v3  ;;  %613 = vmatprep.subr.bf16.mxu0 %v1501_v4  ;;  %v1506_v7 = vld [vmem:[%s2075_s3 + $0x60] ss:$8 sps:$4 sm:$0xff]   ;;  %v1509_v9 = vld [vmem:[%s2075_s3 + $0x54] ss:$8 sps:$4 sm:$0xff]   ;;  %v1512_v11 = vld [vmem:[%s2075_s3 + $0x50] ss:$8 sps:$4 sm:$0xff]  }
   0xf   : > { %818 = vmatprep.subr.bf16.mxu1 %v1503_v5  ;;  %v1513_v12 = vld [vmem:[%s2075_s3 + $0x144] ss:$8 sps:$4 sm:$0xff]   ;;  %v1517_v14 = vld [vmem:[%s2075_s3 + $0x140] ss:$8 sps:$4 sm:$0xff]   ;;  %v1519_v16 = vld [vmem:[%s2075_s3 + $0x134] ss:$8 sps:$4 sm:$0xff]  }
  0x10   : > { %v1515_v13 = vld [vmem:[%s2075_s3 + $0x44] ss:$8 sps:$4 sm:$0xff]   ;;  %v1518_v15 = vld [vmem:[%s2075_s3 + $0x40] ss:$8 sps:$4 sm:$0xff]   ;;  %v1521_v17 = vld [vmem:[%s2075_s3 + $0x34] ss:$8 sps:$4 sm:$0xff]  }
  0x11   : > { %614 = vmatpush1.bf16.msra.mxu0 %v1505_v6  ;;  %v1523_v18 = vld [vmem:[%s2075_s3 + $0x130] ss:$8 sps:$4 sm:$0xff]   ;;  %v1525_v20 = vld [vmem:[%s2075_s3 + $0x124] ss:$8 sps:$4 sm:$0xff]   ;;  %v1529_v22 = vld [vmem:[%s2075_s3 + $0x120] ss:$8 sps:$4 sm:$0xff]  }
  0x12   : > { %819 = vmatpush1.bf16.msra.mxu1 %v1506_v7  ;;  %615 = vmatprep.subr.bf16.mxu0 %v1507_v8  ;;  %v1524_v19 = vld [vmem:[%s2075_s3 + $0x30] ss:$8 sps:$4 sm:$0xff]   ;;  %v1527_v21 = vld [vmem:[%s2075_s3 + $0x24] ss:$8 sps:$4 sm:$0xff]   ;;  %v1530_v23 = vld [vmem:[%s2075_s3 + $0x20] ss:$8 sps:$4 sm:$0xff]  }
  0x13   : > { %820 = vmatprep.subr.bf16.mxu1 %v1509_v9  ;;  %v1531_v24 = vld [vmem:[%s2075_s3 + $0x114] ss:$8 sps:$4 sm:$0xff]   ;;  %v1535_v26 = vld [vmem:[%s2075_s3 + $0x110] ss:$8 sps:$4 sm:$0xff]   ;;  %v1537_v28 = vld [vmem:[%s2075_s3 + $0x104] ss:$8 sps:$4 sm:$0xff]  }
  0x14   : > { %v1533_v25 = vld [vmem:[%s2075_s3 + $0x14] ss:$8 sps:$4 sm:$0xff]   ;;  %v1536_v27 = vld [vmem:[%s2075_s3 + $0x10] ss:$8 sps:$4 sm:$0xff]   ;;  %v1539_v29 = vld [vmem:[%s2075_s3 + $0x4] ss:$8 sps:$4 sm:$0xff]  }
  0x15   : > { %616 = vmatpush1.bf16.msra.mxu0 %v1511_v10  ;;  %v1541_v30 = vld [vmem:[%s2075_s3 + $0x100] ss:$8 sps:$4 sm:$0xff]   ;;  %v1543_v32 = vld [vmem:[%s2075_s3 + $0x1f4] ss:$8 sps:$4 sm:$0xff]   ;;  %v1547_v34 = vld [vmem:[%s2075_s3 + $0x1f0] ss:$8 sps:$4 sm:$0xff]  }
  0x16   : > { %821 = vmatpush1.bf16.msra.mxu1 %v1512_v11  ;;  %617 = vmatprep.subr.bf16.mxu0 %v1513_v12  ;;  %v1542_v31 = vld [vmem:[%s2075_s3] ss:$8 sps:$4 sm:$0xff]   ;;  %v1545_v33 = vld [vmem:[%s2075_s3 + $0xf4] ss:$8 sps:$4 sm:$0xff]   ;;  %v1548_v35 = vld [vmem:[%s2075_s3 + $0xf0] ss:$8 sps:$4 sm:$0xff]  }
  0x17   : > { %822 = vmatprep.subr.bf16.mxu1 %v1515_v13  ;;  %v1549_v37 = vld [vmem:[%s2075_s3 + $0x1e4] ss:$8 sps:$4 sm:$0xff]   ;;  %s2091_s19 = smov (!%p223_p3, %s1295_s19), 1  ;;  %v1553_v39 = vld [vmem:[%s2075_s3 + $0x1e0] ss:$8 sps:$4 sm:$0xff]   ;;  %v1812_v40 = vshrl.u32 %v247_v36, 7 }
  0x18   : > { %v1551_v38 = vld [vmem:[%s2075_s3 + $0xe4] ss:$8 sps:$4 sm:$0xff]   ;;  %v1554_v41 = vld [vmem:[%s2075_s3 + $0xe0] ss:$8 sps:$4 sm:$0xff]   ;;  %v1555_v42 = vld [vmem:[%s2075_s3 + $0x1d4] ss:$8 sps:$4 sm:$0xff]  }
  0x19   : > { %618 = vmatpush1.bf16.msra.mxu0 %v1517_v14  ;;  %v1557_v43 = vld [vmem:[%s2075_s3 + $0xd4] ss:$8 sps:$4 sm:$0xff]   ;;  %s1479_s10 = sshll.u32 %s2091_s19, 4  ;;  %vm282_vm0 = vsmask.f32 256  ;;  %v249_v46 = vsub.s32 0, %v1812_v40 }
  0x1a   : > { %823 = vmatpush1.bf16.msra.mxu1 %v1518_v15  ;;  %619 = vmatprep.subr.bf16.mxu0 %v1519_v16  ;;  %v1559_v44 = vld [vmem:[%s2075_s3 + $0x1d0] ss:$8 sps:$4 sm:$0xff]   ;;  %v253_v47 = vsub.s32 1, %v1812_v40  ;;  %v1561_v48 = vld [vmem:[%s2075_s3 + $0x1c4] ss:$8 sps:$4 sm:$0xff]   ;;  %s227_s21 = scalar_lea.vmem %s2072_s0, %s1479_s10  ;;  %vm281_vm3 = vcmask 1040384   ;;  %s232_s20 = scalar_lea.vmem %s2076_s4, %s1479_s10 }
  0x1b   : > { %824 = vmatprep.subr.bf16.mxu1 %v1521_v17  ;;  %v1560_v45 = vld [vmem:[%s2075_s3 + $0xd0] ss:$8 sps:$4 sm:$0xff]   ;;  %vm285_vm1 = vsmask.f32 4352  ;;  %v1563_v49 = vld [vmem:[%s2075_s3 + $0xc4] ss:$8 sps:$4 sm:$0xff]   ;;  %vm1863_vm5 = vmand %vm281_vm3, %vm282_vm0 }
  0x1c   : > { %vm291_vm2 = vsmask.f32 7938  ;;  %v1565_v50 = vld [vmem:[%s2075_s3 + $0x1c0] ss:$8 sps:$4 sm:$0xff]   ;;  %v1567_v53 = vld [vmem:[%s2075_s3 + $0x1b4] ss:$8 sps:$4 sm:$0xff]  }
  0x1d   : > { %620 = vmatpush1.bf16.msra.mxu0 %v1523_v18  ;;  %v1566_v51 = vld [vmem:[%s2075_s3 + $0xc0] ss:$8 sps:$4 sm:$0xff]   ;;  %vm284_vm4 = vcmask 1044484   ;;  %v1569_v59 = vld [vmem:[%s2075_s3 + $0xb4] ss:$8 sps:$4 sm:$0xff]   ;;  %vm1890_vm9 = vmand %vm281_vm3, %vm291_vm2  ;;  %vm331_vm12 = vcmask 1043456  }
  0x1e   : > { %825 = vmatpush1.bf16.msra.mxu1 %v1524_v19  ;;  %621 = vmatprep.subr.bf16.mxu0 %v1525_v20  ;;  %v239_v52 = vld [vmem:[%s227_s21] sm:$0xff]  ;;  %v240_v54 = vld [vmem:[%s227_s21 + $0x8] sm:$0xff]  ;;  %vm1869_vm6 = vmand %vm284_vm4, %vm285_vm1  ;;  %vm293_vm7 = vsmask.f32 7954  ;;  %vm333_vm13 = vcmask 1047556   ;;  %s1481_s10 = sshll.u32 %s2091_s19, 2 }
  0x1f   : > { %826 = vmatprep.subr.bf16.mxu1 %v1527_v21  ;;  %v241_v55 = vunpack.c.l.bf16 %v239_v52  ;;  %v242_v56 = vunpack.c.h.bf16 %v239_v52  ;;  %v245_v57 = vld [vmem:[%s2073_s1] sm:$0x3]  ;;  %v243_v60 = vunpack.c.l.bf16 %v240_v54  ;;  %v244_v61 = vunpack.c.h.bf16 %v240_v54  ;;  %v288_v1 = vld [vmem:[#allocation2 + $0x8] sm:$0x11]  ;;  %v1571_v5 = vld [vmem:[%s2075_s3 + $0x1b0] ss:$8 sps:$4 sm:$0xff]   ;;  %s237_s23 = scalar_lea.vmem %s2077_s5, %s1481_s10 }
  0x20   : > { %v261_v58 = vld [vmem:[%s2074_s2] sm:$0x3]  ;;  %v250_v62 = vrot.slane %v245_v57, %v249_v46  ;;  %v254_v63 = vrot.slane %v245_v57, %v253_v47  ;;  %v1572_v6 = vld [vmem:[%s2075_s3 + $0xb0] ss:$8 sps:$4 sm:$0xff]   ;;  %vm287_vm8 = vmor %vm1869_vm6, %vm1863_vm5  ;;  %vm309_vm14 = vsmask.f32 4368 }
  0x21   : > { %622 = vmatpush1.bf16.msra.mxu0 %v1529_v22  ;;  %v266_v2 = vrot.slane %v261_v58, %v249_v46  ;;  %v270_v3 = vrot.slane %v261_v58, %v253_v47  ;;  %v296_v11 = vld [vmem:[#allocation2] sm:$0x11]  ;;  %v289_v12 = vsel %vm287_vm8, 0, %v288_v1  ;;  %vm294_vm10 = vmand %vm284_vm4, %vm293_vm7  ;;  %v1595_v57 = vld [vmem:[%s2075_s3 + $0x274] ss:$8 sps:$4 sm:$0xff]   ;;  %vm898_vm4 = vcmask 1046528  }
  0x22   : > { %827 = vmatpush1.bf16.msra.mxu1 %v1530_v23  ;;  %623 = vmatprep.subr.bf16.mxu0 %v1531_v24  ;;  %v257_v7 = vmul.f32 %v250_v62, %v241_v55  ;;  %v258_v8 = vmul.f32 %v254_v63, %v242_v56  ;;  %v259_v9 = vmul.f32 %v250_v62, %v243_v60  ;;  %v1573_v14 = vld [vmem:[%s2075_s3 + $0x1a4] ss:$8 sps:$4 sm:$0xff]   ;;  %vm295_vm11 = vmor %vm294_vm10, %vm1890_vm9  ;;  %v1577_v24 = vld [vmem:[%s2075_s3 + $0x1a0] ss:$8 sps:$4 sm:$0xff]   ;;  %vm1166_vm5 = vcmp.lt.s32.totalorder %v247_v36, 256 }
  0x23   : > { %828 = vmatprep.subr.bf16.mxu1 %v1533_v25  ;;  %v260_v10 = vmul.f32 %v254_v63, %v244_v61  ;;  %v1575_v15 = vld [vmem:[%s2075_s3 + $0xa4] ss:$8 sps:$4 sm:$0xff]   ;;  %290 = vst [vmem:[#allocation2 + $0x8] sm:$0x11] %v289_v12  ;;  %v297_v23 = vsel %vm295_vm11, 0, %v296_v11  ;;  %vm1918_vm15 = vmand %vm331_vm12, %vm291_vm2 }
  0x24   : > { %v273_v16 = vadd.f32 %v266_v2, %v257_v7  ;;  %v274_v17 = vadd.f32 %v270_v3, %v258_v8  ;;  %v275_v18 = vadd.f32 %v266_v2, %v259_v9  ;;  %298 = vst [vmem:[#allocation2] sm:$0x11] %v297_v23  ;;  %vm1930_vm1 = vmand %vm333_vm13, %vm293_vm7  ;;  %v1589_v52 = vld [vmem:[%s2075_s3 + $0x180] ss:$8 sps:$4 sm:$0xff]  }
  0x25   : > { %624 = vmatpush1.bf16.msra.mxu0 %v1535_v26  ;;  %v276_v19 = vadd.f32 %v270_v3, %v260_v10  ;;  %v1578_v26 = vld [vmem:[%s2075_s3 + $0xa0] ss:$8 sps:$4 sm:$0xff]   ;;  %vm1941_vm2 = vmor %vm282_vm0, %vm309_vm14  ;;  %vm424_vm0 = vsmask.f32 7424 }
  0x26   : > { %829 = vmatpush1.bf16.msra.mxu1 %v1536_v27  ;;  %625 = vmatprep.subr.bf16.mxu0 %v1537_v28  ;;  %v277_v20 = vmax.f32 %v273_v16, 0.0  ;;  %v278_v21 = vmax.f32 %v274_v17, 0.0  ;;  %v279_v22 = vmax.f32 %v275_v18, 0.0  ;;  %v1579_v27 = vld [vmem:[%s2075_s3 + $0x194] ss:$8 sps:$4 sm:$0xff]   ;;  %vm335_vm3 = vmor %vm1930_vm1, %vm1918_vm15 }
  0x27   : > { %830 = vmatprep.subr.bf16.mxu1 %v1539_v29  ;;  %v280_v25 = vmax.f32 %v276_v19, 0.0  ;;  %v1581_v29 = vld [vmem:[%s2075_s3 + $0x94] ss:$8 sps:$4 sm:$0xff]   ;;  %v1593_v17 = vld [vmem:[%s2075_s3 + $0x270] ss:$8 sps:$4 sm:$0xff]  }
  0x28   : > { %v1482_v28 = vpack.c.bf16 %v278_v21, %v277_v20  ;;  %v1598_v21 = vld [vmem:[%s2075_s3 + $0x264] ss:$8 sps:$4 sm:$0xff]  }
  0x29   : > { %626 = vmatpush1.bf16.msra.mxu0 %v1541_v30  ;;  %v1483_v30 = vpack.c.bf16 %v280_v25, %v279_v22  ;;  %v1601_v25 = vld [vmem:[%s2075_s3 + $0x254] ss:$8 sps:$4 sm:$0xff]  }
  0x2a   : > { %831 = vmatpush1.bf16.msra.mxu1 %v1542_v31  ;;  %627 = vmatprep.subr.bf16.mxu0 %v1543_v32  ;;  %v1583_v32 = vld [vmem:[%s2075_s3 + $0x190] ss:$8 sps:$4 sm:$0xff]   ;;  %v336_v46 = vld [vmem:[#allocation2 + $0x8] sm:$0xff] }
  0x2b   : > { %832 = vmatprep.subr.bf16.mxu1 %v1545_v33  ;;  %v1584_v33 = vld [vmem:[%s2075_s3 + $0x90] ss:$8 sps:$4 sm:$0xff]   ;;  %v1610_v31 = vld [vmem:[%s2075_s3 + $0x224] ss:$8 sps:$4 sm:$0xff]  }
  0x2d   : > { %628 = vmatpush2.bf16.msra.mxu0 %v1547_v34  ;;  %v312_v34 = vshrl.u32 %v1482_v28, 16 }
  0x2e   : > { %833 = vmatpush2.bf16.msra.mxu1 %v1548_v35  ;;  %629 = vmatprep.subr.bf16.mxu0 %v1549_v37  ;;  %v315_v35 = vshll.u32 %v1482_v28, 16  ;;  %v1602_v28 = vld [vmem:[%s2075_s3 + $0x240] ss:$8 sps:$4 sm:$0xff]  }
  0x2f   : > { %834 = vmatprep.subr.bf16.mxu1 %v1551_v38  ;;  %v1585_v38 = vld [vmem:[%s2075_s3 + $0x184] ss:$8 sps:$4 sm:$0xff]   ;;  %v1614_v37 = vld [vmem:[%s2075_s3 + $0x200] ss:$8 sps:$4 sm:$0xff]  }
  0x31   : > { %630 = vmatpush2.bf16.msra.mxu0 %v1553_v39  ;;  %v320_v39 = vshrl.u32 %v1483_v30, 16 }
  0x32   : > { %835 = vmatpush2.bf16.msra.mxu1 %v1554_v41  ;;  %631 = vmatprep.subr.bf16.mxu0 %v1555_v42  ;;  %v323_v41 = vshll.u32 %v1483_v30, 16  ;;  %v1587_v42 = vld [vmem:[%s2075_s3 + $0x84] ss:$8 sps:$4 sm:$0xff]   ;;  %v1605_v30 = vld [vmem:[%s2075_s3 + $0x230] ss:$8 sps:$4 sm:$0xff]  }
  0x33   : > { %836 = vmatprep.subr.bf16.mxu1 %v1557_v43  ;;  %v1625_v43 = vld [vmem:[%s2075_s3 + $0x2d4] ss:$8 sps:$4 sm:$0xff]  }
  0x35   : > { %632 = vmatpush2.bf16.msra.mxu0 %v1559_v44  ;;  %v314_v44 = vrot.slane %v312_v34, 7  ;;  %v1611_v34 = vld [vmem:[%s2075_s3 + $0x210] ss:$8 sps:$4 sm:$0xff]  }
  0x36   : > { %837 = vmatpush2.bf16.msra.mxu1 %v1560_v45  ;;  %633 = vmatprep.subr.bf16.mxu0 %v1561_v48  ;;  %v322_v45 = vrot.slane %v320_v39, 7  ;;  %v1617_v39 = vld [vmem:[%s2075_s3 + $0x2f0] ss:$8 sps:$4 sm:$0xff]  }
  0x37   : > { %838 = vmatprep.subr.bf16.mxu1 %v1563_v49  ;;  %v317_v47 = vor.u32 %v315_v35, %v314_v44  ;;  %v318_v48 = vrot.slane %v314_v44, 4  ;;  %v340_v49 = vld [vmem:[#allocation2] sm:$0x11]  ;;  %v1623_v44 = vld [vmem:[%s2075_s3 + $0x2d0] ss:$8 sps:$4 sm:$0xff]  }
  0x38   : > { %v1616_v35 = vld [vmem:[%s2075_s3 + $0x204] ss:$8 sps:$4 sm:$0xff]  }
  0x39   : > { %634 = vmatpush2.bf16.msra.mxu0 %v1565_v50  ;;  %v325_v50 = vor.u32 %v323_v41, %v322_v45  ;;  %v337_v54 = vsel %vm335_vm3, %v317_v47, %v336_v46  ;;  %v1622_v41 = vld [vmem:[%s2075_s3 + $0x2e4] ss:$8 sps:$4 sm:$0xff]   ;;  %v1626_v46 = vld [vmem:[%s2075_s3 + $0x2c0] ss:$8 sps:$4 sm:$0xff]   ;;  %v1631_v47 = vld [vmem:[%s2075_s3 + $0x2b4] ss:$8 sps:$4 sm:$0xff]  }
  0x3a   : > { %839 = vmatpush2.bf16.msra.mxu1 %v1566_v51  ;;  %635 = vmatprep.subr.bf16.mxu0 %v1567_v53  ;;  %v327_v51 = vrot.slane %v322_v45, 4  ;;  %v1590_v53 = vld [vmem:[%s2075_s3 + $0x80] ss:$8 sps:$4 sm:$0xff]   ;;  %338 = vst [vmem:[#allocation2 + $0x8] sm:$0xff] %v337_v54  ;;  %v1628_v45 = vld [vmem:[%s2075_s3 + $0x2c4] ss:$8 sps:$4 sm:$0xff]  }
  0x3b   : > { %840 = vmatprep.subr.bf16.mxu1 %v1569_v59  ;;  %v326_v55 = vsel %vm1941_vm2, %v318_v48, %v325_v50  ;;  %v1629_v48 = vld [vmem:[%s2075_s3 + $0x2b0] ss:$8 sps:$4 sm:$0xff]   ;;  %v1632_v50 = vld [vmem:[%s2075_s3 + $0x2a0] ss:$8 sps:$4 sm:$0xff]  }
  0x3c   : > { %v341_v56 = vsel %vm287_vm8, %v327_v51, %v340_v49  ;;  %v1341_v58 = vcombine.high %v337_v54, %v326_v55  ;;  %v1340_v59 = vcombine.low %v337_v54, %v326_v55  ;;  %v1634_v49 = vld [vmem:[%s2075_s3 + $0x2a4] ss:$8 sps:$4 sm:$0xff]   ;;  %v1637_v51 = vld [vmem:[%s2075_s3 + $0x294] ss:$8 sps:$4 sm:$0xff]   ;;  %v1638_v54 = vld [vmem:[%s2075_s3 + $0x280] ss:$8 sps:$4 sm:$0xff]  }
  0x3d   : > { %636 = vmatpush2.bf16.msra.mxu0 %v1571_v5  ;;  %342 = vst [vmem:[#allocation2] sm:$0x11] %v341_v56 }
  0x3e   : > { %841 = vmatpush2.bf16.msra.mxu1 %v1572_v6  ;;  %637 = vmatprep.subr.bf16.mxu0 %v1573_v14  ;;  %v440_v60 = vshll.u32 %v1341_v58, 16  ;;  %v428_v61 = vshll.u32 %v1340_v59, 16  ;;  %v438_v62 = vshrl.u32 %v1341_v58, 16  ;;  %v426_v1 = vshrl.u32 %v1340_v59, 16 }
  0x3f   : > { %842 = vmatprep.subr.bf16.mxu1 %v1575_v15  ;;  %848 = vmatprep.mubr.bf16.mxu1 %v1341_v58 }
  0x40   : > { %v442_v63 = vrot.slane %v440_v60, 1  ;;  %v430_v2 = vrot.slane %v428_v61, 1 }
  0x41   : > { %638 = vmatpush2.bf16.msra.mxu0 %v1577_v24  ;;  %v859_v7 = vld [vmem:[#allocation2 + $0x8] sm:$0xee] }
  0x42   : > { %843 = vmatpush2.bf16.msra.mxu1 %v1578_v26  ;;  %639 = vmatprep.subr.bf16.mxu0 %v1579_v27  ;;  %v443_v5 = vor.u32 %v442_v63, %v438_v62  ;;  %v431_v6 = vor.u32 %v430_v2, %v426_v1  ;;  %v1441_v10 = vcombine.high %v859_v7, %v326_v55  ;;  %v1596_v24 = vld [vmem:[%s2075_s3 + $0x260] ss:$8 sps:$4 sm:$0xff]   ;;  %v1599_v26 = vld [vmem:[%s2075_s3 + $0x250] ss:$8 sps:$4 sm:$0xff]   ;;  %v1604_v27 = vld [vmem:[%s2075_s3 + $0x244] ss:$8 sps:$4 sm:$0xff]  }
  0x43   : > { %844 = vmatprep.subr.bf16.mxu1 %v1581_v29  ;;  %v1440_v12 = vcombine.low %v859_v7, %v326_v55  ;;  %v1607_v29 = vld [vmem:[%s2075_s3 + $0x234] ss:$8 sps:$4 sm:$0xff]  }
  0x44   : > { %v377_v0 = vld [vmem:[#allocation2] sm:$0x11]  ;;  %v902_v16 = vrot.slane %v1441_v10, 1 }
  0x45   : > { %640 = vmatpush2.bf16.msra.mxu0 %v1583_v32  ;;  %v1343_v3 = vcombine.high %v377_v0, %v377_v0  ;;  %v1342_v4 = vcombine.low %v377_v0, %v377_v0  ;;  %v899_v18 = vrot.slane %v1440_v12, 1  ;;  %v1608_v32 = vld [vmem:[%s2075_s3 + $0x220] ss:$8 sps:$4 sm:$0xff]  }
  0x46   : > { %845 = vmatpush2.bf16.msra.mxu1 %v1584_v33  ;;  %641 = vmatprep.subr.bf16.mxu0 %v1585_v38  ;;  %v1613_v33 = vld [vmem:[%s2075_s3 + $0x214] ss:$8 sps:$4 sm:$0xff]  }
  0x47   : > { %846 = vmatprep.subr.bf16.mxu1 %v1587_v42  ;;  %v445_v8 = vshll.u32 %v1343_v3, 16  ;;  %v433_v9 = vshll.u32 %v1342_v4, 16  ;;  %v903_v11 = vrot.slane %v1343_v3, 1  ;;  %v900_v13 = vrot.slane %v1342_v4, 1  ;;  %v1619_v38 = vld [vmem:[%s2075_s3 + $0x2f4] ss:$8 sps:$4 sm:$0xff]  }
  0x48   : > { %v1620_v42 = vld [vmem:[%s2075_s3 + $0x2e0] ss:$8 sps:$4 sm:$0xff]  }
  0x49   : > { %642 = vmatpush2.bf16.msra.mxu0 %v1589_v52  ;;  %v447_v14 = vrot.slane %v445_v8, 1  ;;  %v435_v15 = vrot.slane %v433_v9, 1  ;;  %v904_v22 = vsel %vm898_vm4, %v902_v16, %v903_v11  ;;  %v901_v23 = vsel %vm898_vm4, %v899_v18, %v900_v13  ;;  %v1635_v52 = vld [vmem:[%s2075_s3 + $0x290] ss:$8 sps:$4 sm:$0xff]  }
  0x4a   : > { %847 = vmatpush2.bf16.msra.mxu1 %v1590_v53  ;;  %1067 = vmatprep.subr.bf16.mxu0 %v1595_v57  ;;  %v1640_v53 = vld [vmem:[%s2075_s3 + $0x284] ss:$8 sps:$4 sm:$0xff]  }
  0x4b   : > { %v448_v19 = vsel %vm424_vm0, %v443_v5, %v447_v14  ;;  %v436_v20 = vsel %vm424_vm0, %v431_v6, %v435_v15 }
  0x4c   : > { %643 = vmatprep.mubr.bf16.mxu0 %v448_v19 }
  0x4d   : > { %849 = vmatmul.mubr.bf16.vlgmr.msra.gmra.mxu1 %v1340_v59  ;;  %644 = vmatmul.mubr.bf16.vlgmr.msra.gmra.mxu0 %v436_v20 }
  0x4e   : > { %1068 = vmatpush1.bf16.msra.mxu0 %v1593_v17  ;;  %1099 = vmatprep.mubr.bf16.mxu0 %v904_v22 }
  0x4f   : > { %1069 = vmatprep.subr.bf16.mxu0 %v1598_v21 }
  0x52   : > { %1070 = vmatpush1.bf16.msra.mxu0 %v1596_v24 }
  0x53   : > { %1071 = vmatprep.subr.bf16.mxu0 %v1601_v25 }
  0x56   : > { %1072 = vmatpush1.bf16.msra.mxu0 %v1599_v26 }
  0x57   : > { %1073 = vmatprep.subr.bf16.mxu0 %v1604_v27 }
  0x5a   : > { %1074 = vmatpush1.bf16.msra.mxu0 %v1602_v28 }
  0x5b   : > { %1075 = vmatprep.subr.bf16.mxu0 %v1607_v29 }
  0x5e   : > { %1076 = vmatpush1.bf16.msra.mxu0 %v1605_v30 }
  0x5f   : > { %1077 = vmatprep.subr.bf16.mxu0 %v1610_v31 }
  0x62   : > { %1078 = vmatpush1.bf16.msra.mxu0 %v1608_v32 }
  0x63   : > { %1079 = vmatprep.subr.bf16.mxu0 %v1613_v33 }
  0x66   : > { %1080 = vmatpush1.bf16.msra.mxu0 %v1611_v34  ;;  %v1649_v34 = vmov 1966171168  }
  0x67   : > { %1081 = vmatprep.subr.bf16.mxu0 %v1616_v35  ;;  %v1150_v35 = vunpack.c.l.s4 %v1649_v34 }
  0x6a   : > { %1082 = vmatpush1.bf16.msra.mxu0 %v1614_v37 }
  0x6b   : > { %1083 = vmatprep.subr.bf16.mxu0 %v1619_v38 }
  0x6e   : > { %1084 = vmatpush2.bf16.msra.mxu0 %v1617_v39 }
  0x6f   : > { %1085 = vmatprep.subr.bf16.mxu0 %v1622_v41 }
  0x72   : > { %1086 = vmatpush2.bf16.msra.mxu0 %v1620_v42 }
  0x73   : > { %1087 = vmatprep.subr.bf16.mxu0 %v1625_v43 }
  0x76   : > { %1088 = vmatpush2.bf16.msra.mxu0 %v1623_v44 }
  0x77   : > { %1089 = vmatprep.subr.bf16.mxu0 %v1628_v45 }
  0x7a   : > { %1090 = vmatpush2.bf16.msra.mxu0 %v1626_v46  ;;  %v1151_v46 = vunpack.c.0.s8 %v1150_v35 }
  0x7b   : > { %1091 = vmatprep.subr.bf16.mxu0 %v1631_v47 }
  0x7e   : > { %1092 = vmatpush2.bf16.msra.mxu0 %v1629_v48 }
  0x7f   : > { %1093 = vmatprep.subr.bf16.mxu0 %v1634_v49 }
  0x82   : > { %1094 = vmatpush2.bf16.msra.mxu0 %v1632_v50 }
  0x83   : > { %1095 = vmatprep.subr.bf16.mxu0 %v1637_v51 }
  0x86   : > { %1096 = vmatpush2.bf16.msra.mxu0 %v1635_v52 }
  0x87   : > { %1097 = vmatprep.subr.bf16.mxu0 %v1640_v53  ;;  %v1154_v53 = vsub.s32 %v1151_v46, %v1812_v40 }
  0x8a   : > { %1098 = vmatpush2.bf16.msra.mxu0 %v1638_v54 }
  0x8d   : > { %1100 = vmatmul.mubr.bf16.vlgmr.msra.gmra.mxu0 %v901_v23 }
 0x10d   : > { %v645_v55 = vpop.f32.mrf.mxu0  ;;  %v850_v56 = vpop.f32.mrf.mxu1 }
 0x10e   : > { %v851_v63 = vadd.f32 %v850_v56, %v645_v55 }
 0x10f   : > { %v647_v57 = vpop.f32.mrf.mxu0  ;;  %v852_v58 = vpop.f32.mrf.mxu1 }
 0x110   : > { %v853_v1 = vadd.f32 %v852_v58, %v647_v57 }
 0x111   : > { %v649_v59 = vpop.f32.mrf.mxu0  ;;  %v854_v60 = vpop.f32.mrf.mxu1 }
 0x112   : > { %v855_v3 = vadd.f32 %v854_v60, %v649_v59 }
 0x113   : > { %v651_v61 = vpop.f32.mrf.mxu0  ;;  %v856_v2 = vpop.f32.mrf.mxu1 }
 0x114   : > { %v857_v7 = vadd.f32 %v856_v2, %v651_v61 }
 0x14d   : > { %v1101_v62 = vpop.f32.mrf.mxu0 }
 0x14e   : > { %v1110_v4 = vadd.f32 %v1101_v62, %v851_v63 }
 0x14f   : > { %v1103_v0 = vpop.f32.mrf.mxu0 }
 0x150   : > { %v1111_v5 = vadd.f32 %v1103_v0, %v853_v1 }
 0x151   : > { %v1105_v6 = vpop.f32.mrf.mxu0 }
 0x152   : > { %v1484_v8 = vpack.c.bf16 %v1111_v5, %v1110_v4  ;;  %v1112_v9 = vadd.f32 %v1105_v6, %v855_v3 }
 0x153   : > { %v1107_v10 = vpop.f32.mrf.mxu0 }
 0x154   : > { %1126 = vst [vmem:[%s232_s20] sm:$0xff] %v1484_v8  ;;  %v1114_v11 = vpack.c.bf16 %v1112_v9, %v1110_v4  ;;  %v1113_v12 = vadd.f32 %v1107_v10, %v857_v7 }
 0x156   : > { %v1128_v13 = vunpack.c.l.bf16 %v1114_v11  ;;  %v1130_v14 = vunpack.c.h.bf16 %v1114_v11  ;;  %v1115_v15 = vpack.c.bf16 %v1113_v12, %v1111_v5  ;;  %v1485_v16 = vpack.c.bf16 %v1113_v12, %v1112_v9 }
 0x158   : > { %v1132_v17 = vadd.f32 %v1130_v14, %v1128_v13  ;;  %v1169_v18 = vmul.f32 %v1128_v13, %v1128_v13  ;;  %v1171_v19 = vmul.f32 %v1130_v14, %v1130_v14  ;;  %1127 = vst [vmem:[%s232_s20 + $0x8] sm:$0xff] %v1485_v16  ;;  %v1129_v20 = vunpack.c.l.bf16 %v1115_v15 }
 0x159   : > { %v1131_v21 = vunpack.c.h.bf16 %v1115_v15 }
 0x15a   : > { %v1133_v22 = vrot.slane %v1132_v17, 4  ;;  %v1173_v23 = vadd.f32 %v1171_v19, %v1169_v18  ;;  %v1170_v24 = vmul.f32 %v1129_v20, %v1129_v20 }
 0x15b   : > { %v1139_v25 = vadd.f32 %v1131_v21, %v1129_v20  ;;  %v1172_v26 = vmul.f32 %v1131_v21, %v1131_v21 }
 0x15c   : > { %v1134_v27 = vadd.f32 %v1133_v22, %v1132_v17  ;;  %v1174_v28 = vrot.slane %v1173_v23, 4 }
 0x15d   : > { %v1140_v29 = vrot.slane %v1139_v25, 4  ;;  %v1180_v30 = vadd.f32 %v1172_v26, %v1170_v24 }
 0x15e   : > { %v1135_v31 = vrot.slane %v1134_v27, 2  ;;  %v1175_v32 = vadd.f32 %v1174_v28, %v1173_v23 }
 0x15f   : > { %v1141_v33 = vadd.f32 %v1140_v29, %v1139_v25  ;;  %v1181_v37 = vrot.slane %v1180_v30, 4 }
 0x160   : > { %v1136_v38 = vadd.f32 %v1135_v31, %v1134_v27  ;;  %v1176_v39 = vrot.slane %v1175_v32, 2 }
 0x161   : > { %v1142_v41 = vrot.slane %v1141_v33, 2  ;;  %v1182_v42 = vadd.f32 %v1181_v37, %v1180_v30 }
 0x162   : > { %v1177_v43 = vadd.f32 %v1176_v39, %v1175_v32  ;;  %v1137_v44 = vrot.slane %v1136_v38, 1 }
 0x163   : > { %v1143_v45 = vadd.f32 %v1142_v41, %v1141_v33  ;;  %v1183_v47 = vrot.slane %v1182_v42, 2 }
 0x164   : > { %v1178_v48 = vrot.slane %v1177_v43, 1  ;;  %v1138_v51 = vadd.f32 %v1137_v44, %v1136_v38 }
 0x165   : > { %v1144_v49 = vrot.slane %v1143_v45, 1  ;;  %v1184_v50 = vadd.f32 %v1183_v47, %v1182_v42 }
 0x166   : > { %v1179_v55 = vadd.f32 %v1178_v48, %v1177_v43 }
 0x167   : > { %v1145_v52 = vadd.f32 %v1144_v49, %v1143_v45  ;;  %v1185_v54 = vrot.slane %v1184_v50, 1 }
 0x169   : > { %v1148_v56 = vcombine.low %v1138_v51, %v1145_v52  ;;  %v1186_v57 = vadd.f32 %v1185_v54, %v1184_v50 }
 0x16b   : > { %v1155_v58 = vrot.slane %v1148_v56, %v1154_v53  ;;  %v1189_v59 = vcombine.low %v1179_v55, %v1186_v57 }
 0x16d   : > { %v1162_v60 = vrot.slane %v1155_v58, %v1154_v53  ;;  %v1196_v61 = vrot.slane %v1189_v59, %v1154_v53 }
 0x16f   : > { %1168 = vst.msk [vmem:[%s237_s23] ss:$2 sm:$0x3] %vm1166_vm5, %v1162_v60  ;;  %v1203_v62 = vrot.slane %v1196_v61, %v1154_v53 }
 0x171   : > { %1476 = vst.msk [vmem:[%s237_s23 + $0x1] ss:$2 sm:$0x3] %vm1166_vm5, %v1203_v62 }
 0x172 PF: > { %s16_s18 = sadd.s32 1, %s1647_s18  }
 0x173   : > { %p13_p4 = scmp.ge.s32.totalorder %s16_s18, 4  }
 0x175   :  { %15 = sbr.rel (!%p13_p4) target bundleno = 1 (0x1), region = 81 }

// kernel: down_block_forward.5
= control target key start
LH: loop header
LB: loop body
LE: loop exit
PB: predicated region body
PF: predicated region fallthrough
CT: control target
= control target key end

     0   :  { %s335_s12 = smov 0   ;;  %s361_s0 = inlined_call_operand.vmem [shape: bf16[2,16,256], index: 0, kind: input, shape index: {}]   ;;  %s362_s1 = inlined_call_operand.vmem [shape: f32[1,256], index: 1, kind: input, shape index: {}]   ;;  %s363_s2 = inlined_call_operand.vmem [shape: f32[1,256], index: 2, kind: input, shape index: {}]   ;;  %s364_s3 = inlined_call_operand.vmem [shape: bf16[2,16,256], index: 3, kind: output, shape index: {}]  }
   0x1 LB: > { %s282_s13 = sadd.s32 4294967295, %s313_s12   ;;  %p286_p0 = scmp.ge.s32.totalorder %s313_s12, 1  ;;  %s313_s12 = sphi %s335_s12, %s13_s12  }
   0x2   : > { %p137_p1 = scmp.lt.s32.totalorder %s313_s12, 3 }
   0x4   : > { %p138_p2 = pnand %p286_p0, %p137_p1 }
   0x5   : > { %p161_p3 = scmp.lt.s32.totalorder (!%p138_p2), %s282_s13, 1 }
   0x6   : > { %141 = sbr.rel (%p138_p2) target bundleno = 28 (0x1c), region = 32 }
   0xb   : > { %v179_v0 = vlaneseq  ;;  %s366_s13 = smov (!%p161_p3, %s282_s13), 1  ;;  %v177_v2 = vld [vmem:[%s362_s1] sm:$0x3] }
   0xc   : > { %v193_v3 = vld [vmem:[%s363_s2] sm:$0x3]  ;;  %s295_s18 = sshll.u32 %s366_s13, 4 }
   0xd   : > { %v180_v1 = vshrl.u32 %v179_v0, 7  ;;  %s165_s21 = scalar_lea.vmem %s361_s0, %s295_s18  ;;  %s170_s24 = scalar_lea.vmem %s364_s3, %s295_s18 }
   0xe   : > { %v171_v6 = vld [vmem:[%s165_s21] sm:$0xff]  ;;  %v172_v7 = vld [vmem:[%s165_s21 + $0x8] sm:$0xff] }
   0xf   : > { %v181_v4 = vsub.s32 0, %v180_v1  ;;  %v185_v5 = vsub.s32 1, %v180_v1  ;;  %v173_v12 = vunpack.c.l.bf16 %v171_v6  ;;  %v174_v13 = vunpack.c.h.bf16 %v171_v6 }
  0x10   : > { %v175_v14 = vunpack.c.l.bf16 %v172_v7  ;;  %v176_v15 = vunpack.c.h.bf16 %v172_v7 }
  0x11   : > { %v182_v8 = vrot.slane %v177_v2, %v181_v4  ;;  %v186_v9 = vrot.slane %v177_v2, %v185_v5  ;;  %v198_v10 = vrot.slane %v193_v3, %v181_v4  ;;  %v202_v11 = vrot.slane %v193_v3, %v185_v5 }
  0x13   : > { %v189_v16 = vmul.f32 %v182_v8, %v173_v12  ;;  %v190_v17 = vmul.f32 %v186_v9, %v174_v13  ;;  %v191_v18 = vmul.f32 %v182_v8, %v175_v14  ;;  %v192_v19 = vmul.f32 %v186_v9, %v176_v15 }
  0x15   : > { %v205_v20 = vadd.f32 %v198_v10, %v189_v16  ;;  %v206_v21 = vadd.f32 %v202_v11, %v190_v17  ;;  %v207_v22 = vadd.f32 %v198_v10, %v191_v18  ;;  %v208_v23 = vadd.f32 %v202_v11, %v192_v19 }
  0x17   : > { %v209_v24 = vmax.f32 %v205_v20, 0.0  ;;  %v210_v25 = vmax.f32 %v206_v21, 0.0  ;;  %v211_v26 = vmax.f32 %v207_v22, 0.0  ;;  %v212_v27 = vmax.f32 %v208_v23, 0.0 }
  0x19   : > { %v297_v28 = vpack.c.bf16 %v210_v25, %v209_v24  ;;  %v298_v29 = vpack.c.bf16 %v212_v27, %v211_v26 }
  0x1b   : > { %225 = vst [vmem:[%s170_s24] sm:$0xff] %v297_v28  ;;  %226 = vst [vmem:[%s170_s24 + $0x8] sm:$0xff] %v298_v29 }
  0x1c PF: > { %s13_s12 = sadd.s32 1, %s313_s12  }
  0x1d   : > { %p10_p4 = scmp.ge.s32.totalorder %s13_s12, 4  }
  0x1f   :  { %12 = sbr.rel (!%p10_p4) target bundleno = 1 (0x1), region = 62 }

</bundles_post_ra>
